<compile_context>
chip_gen: v6e
topology: v6e:2x2x1
jax: 0.10.0
libtpu: 0.0.40
codegen_flags: <defaults>
</compile_context>

<pallas_src>
import jax
import jax.numpy as jnp
from jax.experimental import pallas as pl
from jax.experimental.pallas import tpu as pltpu


def _round_up(x, m):
    return (x + m - 1) // m * m


def _cdiv(a, b):
    return (a + b - 1) // b


# Per-layer padded feature dims: layer i maps _PADDED_DIMS[i] -> _PADDED_DIMS[i+1].
# 180->192 and 150->160 are zero-padded (sublane-friendly, MXU-pass-neutral).
_PADDED_DIMS = (250, 192, 160, 128, 64, 64, 32, 16)


def _ann_kernel(x_ref,
                w1, b1, w2, b2, w3, b3, w4, b4, w5, b5, w6, b6, w7, b7,
                w8, b8, o_ref):
    """Fused MLP: 7x (bf16 matmul + f32 bias/ReLU -> bf16) + f32 dot head."""

    def dense_relu(h, w_ref, b_ref):
        # bf16 MXU matmul with f32 accumulation; bias + ReLU in f32 (v5e has
        # no bf16 VALU), then cast back to bf16 so intermediates stay half-width.
        y = jnp.dot(h, w_ref[...], preferred_element_type=jnp.float32)
        return jnp.maximum(y + b_ref[...], 0.0).astype(jnp.bfloat16)

    h = x_ref[...].astype(jnp.bfloat16)   # (bt, 250): cast in-kernel, no HBM pad pass
    h = dense_relu(h, w1, b1)             # 250 -> 192 (180 zero-padded)
    h = dense_relu(h, w2, b2)             # 192 -> 160 (150 zero-padded)
    h = dense_relu(h, w3, b3)             # 160 -> 128
    # dropout(p=0.1): identity at inference
    h = dense_relu(h, w4, b4)             # 128 -> 64
    h = dense_relu(h, w5, b5)             # 64  -> 64
    h = dense_relu(h, w6, b6)             # 64  -> 32
    h = dense_relu(h, w7, b7)             # 32  -> 16
    # dropout(p=0.1): identity at inference
    # Final 16 -> 1: VPU multiply + lane reduce instead of an N=1 MXU matmul.
    # The (bt,) -> (1, bt) relayout is XLU-slot work, expected to stay hidden
    # under the MXU-bound layers (re-check in xprof if bt is pushed past 4096).
    y = jnp.sum(h * w8[...], axis=-1)            # (bt,)  f32
    y = y[None, :] + b8[...]                     # (1, bt) lane-dense row
    o_ref[...] = y[None].astype(o_ref.dtype)     # (1, 1, bt)


def ann_forward(x, params, *, batch_tile=2048):
    """x: [B, 250] (f32 or bf16). params: list of 8 (W, b), W stored [in, out]."""
    B, D_in = x.shape
    assert D_in == 250 and len(params) == 8

    # --- batch tiling -------------------------------------------------------
    bt_cap = max(128, _round_up(batch_tile, 128))
    n_tiles = _cdiv(B, bt_cap)
    if B > 128:
        n_tiles = max(n_tiles, 2)          # v7x: give both TensorCores a tile
    bt = _round_up(_cdiv(B, n_tiles), 128)  # multiple of 128 -> unmasked lane-dense out
    b_pad = n_tiles * bt

    # Batch-only zero pad (no dtype change, no feature pad -> no extra HBM
    # pass over x); skipped entirely when B is already a tile multiple.
    x_p = x if b_pad == B else jnp.pad(x, ((0, b_pad - B), (0, 0)))

    # --- parameters (tiny; padded + cast per call) ---------------------------
    flat, specs = [], []
    for li in range(7):
        w, b = params[li]
        d_in, d_out = w.shape
        pi, po = _PADDED_DIMS[li], _PADDED_DIMS[li + 1]
        w_p = jnp.pad(w, ((0, pi - d_in), (0, po - d_out))).astype(jnp.bfloat16)
        b_p = jnp.pad(b, (0, po - d_out)).reshape(1, po).astype(jnp.float32)
        flat += [w_p, b_p]
        specs += [pl.BlockSpec(w_p.shape, lambda i: (0, 0)),
                  pl.BlockSpec(b_p.shape, lambda i: (0, 0))]
    w8, b8 = params[7]
    w8_row = w8.reshape(1, -1).astype(jnp.float32)        # (1, 16)
    b8_sc = b8.reshape(1, 1).astype(jnp.float32)          # (1, 1)
    flat += [w8_row, b8_sc]
    specs += [pl.BlockSpec(w8_row.shape, lambda i: (0, 0)),
              pl.BlockSpec(b8_sc.shape, lambda i: (0, 0))]

    x_spec = pl.BlockSpec((bt, D_in), lambda i: (i, 0))    # 250 = full last dim
    out_spec = pl.BlockSpec((1, 1, bt), lambda i: (i, 0, 0))

    macs_per_row = sum(_PADDED_DIMS[i] * _PADDED_DIMS[i + 1] for i in range(7)) + 16
    param_bytes = sum(int(a.size) * a.dtype.itemsize for a in flat)
    cost = pl.CostEstimate(
        flops=2 * b_pad * macs_per_row,
        transcendentals=0,
        bytes_accessed=b_pad * D_in * x_p.dtype.itemsize + b_pad * 4 + param_bytes)

    out = pl.pallas_call(
        _ann_kernel,
        out_shape=jax.ShapeDtypeStruct((n_tiles, 1, bt), jnp.float32),
        grid_spec=pltpu.PrefetchScalarGridSpec(
            num_scalar_prefetch=0,
            grid=(n_tiles,),
            in_specs=[x_spec] + specs,
            out_specs=out_spec,
        ),
        compiler_params=pltpu.CompilerParams(
            dimension_semantics=("parallel",),
            vmem_limit_bytes=32 * 1024 * 1024),
        cost_estimate=cost,
    )(x_p, *flat)

    # Lane-dense (n_tiles, 1, bt) slab -> logical (B, 1) column.
    return out.reshape(b_pad, 1)[:B]


def init_params(key):
    """Deterministic init matching nn.Linear shapes (stored as [in, out])."""
    dims = [250, 180, 150, 128, 64, 64, 32, 16, 1]
    params = []
    for i in range(len(dims) - 1):
        d_in, d_out = dims[i], dims[i + 1]
        key, kw, kb = jax.random.split(key, 3)
        bound = 1.0 / jnp.sqrt(d_in)  # PyTorch nn.Linear default uniform bound
        w = jax.random.uniform(kw, (d_in, d_out), jnp.float32, -bound, bound)
        b = jax.random.uniform(kb, (d_out,), jnp.float32, -bound, bound)
        params.append((w, b))
    return params


def ann_reference(x, params):
    """Pure-JAX reference mirroring the kernel's bf16 matmul/activation numerics."""
    h = x.astype(jnp.bfloat16)
    for (w, b) in params[:7]:
        y = jnp.dot(h, w.astype(jnp.bfloat16), preferred_element_type=jnp.float32)
        h = jnp.maximum(y + b, 0.0).astype(jnp.bfloat16)
    w8, b8 = params[7]
    return h.astype(jnp.float32) @ w8 + b8


if __name__ == "__main__":
    key = jax.random.PRNGKey(0)
    kx, kp = jax.random.split(key)

    B = 200  # not a tile multiple -> exercises batch padding; n_tiles == 2
    x = jax.random.normal(kx, (B, 250), jnp.float32)
    params = init_params(kp)

    out = jax.block_until_ready(ann_forward(x, params))
    ref = ann_reference(x, params)

    assert out.shape == (B, 1), out.shape
    assert jnp.allclose(out, ref, atol=1e-2, rtol=1e-2), (
        float(jnp.max(jnp.abs(out - ref))))

    print("KERNEL_OK")
</pallas_src>

<mosaic_0001>
module attributes {stable_mosaic.version = 11 : i64} {
  func.func @_ann_kernel(%arg0: i32, %arg1: memref<128x250xf32, #tpu.memory_space<vmem>>, %arg2: memref<250x192xbf16, #tpu.memory_space<vmem>>, %arg3: memref<1x192xf32, #tpu.memory_space<vmem>>, %arg4: memref<192x160xbf16, #tpu.memory_space<vmem>>, %arg5: memref<1x160xf32, #tpu.memory_space<vmem>>, %arg6: memref<160x128xbf16, #tpu.memory_space<vmem>>, %arg7: memref<1x128xf32, #tpu.memory_space<vmem>>, %arg8: memref<128x64xbf16, #tpu.memory_space<vmem>>, %arg9: memref<1x64xf32, #tpu.memory_space<vmem>>, %arg10: memref<64x64xbf16, #tpu.memory_space<vmem>>, %arg11: memref<1x64xf32, #tpu.memory_space<vmem>>, %arg12: memref<64x32xbf16, #tpu.memory_space<vmem>>, %arg13: memref<1x32xf32, #tpu.memory_space<vmem>>, %arg14: memref<32x16xbf16, #tpu.memory_space<vmem>>, %arg15: memref<1x16xf32, #tpu.memory_space<vmem>>, %arg16: memref<1x16xf32, #tpu.memory_space<vmem>>, %arg17: memref<1x1xf32, #tpu.memory_space<vmem>>, %arg18: memref<1x1x128xf32, #tpu.memory_space<vmem>>) attributes {dimension_semantics = [#tpu.dimension_semantics<parallel>], iteration_bounds = array<i64: 2>, scalar_prefetch = 0 : i64, scratch_operands = 0 : i64, tpu.core_type = #tpu.core_type<tc>, window_params = [{transform_indices = @transform_0, window_bounds = array<i64: 128, 250>}, {pipeline_mode = #tpu.pipeline_mode<synchronous>, transform_indices = @transform_1, window_bounds = array<i64: 250, 192>}, {pipeline_mode = #tpu.pipeline_mode<synchronous>, transform_indices = @transform_2, window_bounds = array<i64: 1, 192>}, {pipeline_mode = #tpu.pipeline_mode<synchronous>, transform_indices = @transform_3, window_bounds = array<i64: 192, 160>}, {pipeline_mode = #tpu.pipeline_mode<synchronous>, transform_indices = @transform_4, window_bounds = array<i64: 1, 160>}, {pipeline_mode = #tpu.pipeline_mode<synchronous>, transform_indices = @transform_5, window_bounds = array<i64: 160, 128>}, {pipeline_mode = #tpu.pipeline_mode<synchronous>, transform_indices = @transform_6, window_bounds = array<i64: 1, 128>}, {pipeline_mode = #tpu.pipeline_mode<synchronous>, transform_indices = @transform_7, window_bounds = array<i64: 128, 64>}, {pipeline_mode = #tpu.pipeline_mode<synchronous>, transform_indices = @transform_8, window_bounds = array<i64: 1, 64>}, {pipeline_mode = #tpu.pipeline_mode<synchronous>, transform_indices = @transform_9, window_bounds = array<i64: 64, 64>}, {pipeline_mode = #tpu.pipeline_mode<synchronous>, transform_indices = @transform_10, window_bounds = array<i64: 1, 64>}, {pipeline_mode = #tpu.pipeline_mode<synchronous>, transform_indices = @transform_11, window_bounds = array<i64: 64, 32>}, {pipeline_mode = #tpu.pipeline_mode<synchronous>, transform_indices = @transform_12, window_bounds = array<i64: 1, 32>}, {pipeline_mode = #tpu.pipeline_mode<synchronous>, transform_indices = @transform_13, window_bounds = array<i64: 32, 16>}, {pipeline_mode = #tpu.pipeline_mode<synchronous>, transform_indices = @transform_14, window_bounds = array<i64: 1, 16>}, {pipeline_mode = #tpu.pipeline_mode<synchronous>, transform_indices = @transform_15, window_bounds = array<i64: 1, 16>}, {pipeline_mode = #tpu.pipeline_mode<synchronous>, transform_indices = @transform_16, window_bounds = array<i64: 1, 1>}, {transform_indices = @transform_17, window_bounds = array<i64: 1, 1, 128>}]} {
    %c0 = arith.constant 0 : index
    %c0_0 = arith.constant 0 : index
    %0 = vector.load %arg1[%c0, %c0_0] : memref<128x250xf32, #tpu.memory_space<vmem>>, vector<128x250xf32>
    %1 = arith.truncf %0 : vector<128x250xf32> to vector<128x250xbf16>
    %c0_1 = arith.constant 0 : index
    %c0_2 = arith.constant 0 : index
    %2 = vector.load %arg2[%c0_1, %c0_2] : memref<250x192xbf16, #tpu.memory_space<vmem>>, vector<250x192xbf16>
    %cst = arith.constant dense<0.000000e+00> : vector<128x192xf32>
    %3 = tpu.matmul %1, %2, %cst {dimension_numbers = #tpu.dot_dimension_numbers<[1], [0], [0], [1], [0, 0, 1, 1], [], []>} : vector<128x250xbf16>, vector<250x192xbf16>, vector<128x192xf32> -> vector<128x192xf32>
    %c0_3 = arith.constant 0 : index
    %c0_4 = arith.constant 0 : index
    %4 = vector.load %arg3[%c0_3, %c0_4] : memref<1x192xf32, #tpu.memory_space<vmem>>, vector<1x192xf32>
    %5 = vector.broadcast %4 : vector<1x192xf32> to vector<128x192xf32>
    %6 = arith.addf %3, %5 : vector<128x192xf32>
    %cst_5 = arith.constant 0.000000e+00 : f32
    %7 = vector.broadcast %cst_5 : f32 to vector<128x192xf32>
    %8 = arith.maximumf %6, %7 : vector<128x192xf32>
    %9 = arith.truncf %8 : vector<128x192xf32> to vector<128x192xbf16>
    %c0_6 = arith.constant 0 : index
    %c0_7 = arith.constant 0 : index
    %10 = vector.load %arg4[%c0_6, %c0_7] : memref<192x160xbf16, #tpu.memory_space<vmem>>, vector<192x160xbf16>
    %cst_8 = arith.constant dense<0.000000e+00> : vector<128x160xf32>
    %11 = tpu.matmul %9, %10, %cst_8 {dimension_numbers = #tpu.dot_dimension_numbers<[1], [0], [0], [1], [0, 0, 1, 1], [], []>} : vector<128x192xbf16>, vector<192x160xbf16>, vector<128x160xf32> -> vector<128x160xf32>
    %c0_9 = arith.constant 0 : index
    %c0_10 = arith.constant 0 : index
    %12 = vector.load %arg5[%c0_9, %c0_10] : memref<1x160xf32, #tpu.memory_space<vmem>>, vector<1x160xf32>
    %13 = vector.broadcast %12 : vector<1x160xf32> to vector<128x160xf32>
    %14 = arith.addf %11, %13 : vector<128x160xf32>
    %cst_11 = arith.constant 0.000000e+00 : f32
    %15 = vector.broadcast %cst_11 : f32 to vector<128x160xf32>
    %16 = arith.maximumf %14, %15 : vector<128x160xf32>
    %17 = arith.truncf %16 : vector<128x160xf32> to vector<128x160xbf16>
    %c0_12 = arith.constant 0 : index
    %c0_13 = arith.constant 0 : index
    %18 = vector.load %arg6[%c0_12, %c0_13] : memref<160x128xbf16, #tpu.memory_space<vmem>>, vector<160x128xbf16>
    %cst_14 = arith.constant dense<0.000000e+00> : vector<128x128xf32>
    %19 = tpu.matmul %17, %18, %cst_14 {dimension_numbers = #tpu.dot_dimension_numbers<[1], [0], [0], [1], [0, 0, 1, 1], [], []>} : vector<128x160xbf16>, vector<160x128xbf16>, vector<128x128xf32> -> vector<128x128xf32>
    %c0_15 = arith.constant 0 : index
    %c0_16 = arith.constant 0 : index
    %20 = vector.load %arg7[%c0_15, %c0_16] : memref<1x128xf32, #tpu.memory_space<vmem>>, vector<1x128xf32>
    %21 = vector.broadcast %20 : vector<1x128xf32> to vector<128x128xf32>
    %22 = arith.addf %19, %21 : vector<128x128xf32>
    %cst_17 = arith.constant 0.000000e+00 : f32
    %23 = vector.broadcast %cst_17 : f32 to vector<128x128xf32>
    %24 = arith.maximumf %22, %23 : vector<128x128xf32>
    %25 = arith.truncf %24 : vector<128x128xf32> to vector<128x128xbf16>
    %c0_18 = arith.constant 0 : index
    %c0_19 = arith.constant 0 : index
    %26 = vector.load %arg8[%c0_18, %c0_19] : memref<128x64xbf16, #tpu.memory_space<vmem>>, vector<128x64xbf16>
    %cst_20 = arith.constant dense<0.000000e+00> : vector<128x64xf32>
    %27 = tpu.matmul %25, %26, %cst_20 {dimension_numbers = #tpu.dot_dimension_numbers<[1], [0], [0], [1], [0, 0, 1, 1], [], []>} : vector<128x128xbf16>, vector<128x64xbf16>, vector<128x64xf32> -> vector<128x64xf32>
    %c0_21 = arith.constant 0 : index
    %c0_22 = arith.constant 0 : index
    %28 = vector.load %arg9[%c0_21, %c0_22] : memref<1x64xf32, #tpu.memory_space<vmem>>, vector<1x64xf32>
    %29 = vector.broadcast %28 : vector<1x64xf32> to vector<128x64xf32>
    %30 = arith.addf %27, %29 : vector<128x64xf32>
    %cst_23 = arith.constant 0.000000e+00 : f32
    %31 = vector.broadcast %cst_23 : f32 to vector<128x64xf32>
    %32 = arith.maximumf %30, %31 : vector<128x64xf32>
    %33 = arith.truncf %32 : vector<128x64xf32> to vector<128x64xbf16>
    %c0_24 = arith.constant 0 : index
    %c0_25 = arith.constant 0 : index
    %34 = vector.load %arg10[%c0_24, %c0_25] : memref<64x64xbf16, #tpu.memory_space<vmem>>, vector<64x64xbf16>
    %cst_26 = arith.constant dense<0.000000e+00> : vector<128x64xf32>
    %35 = tpu.matmul %33, %34, %cst_26 {dimension_numbers = #tpu.dot_dimension_numbers<[1], [0], [0], [1], [0, 0, 1, 1], [], []>} : vector<128x64xbf16>, vector<64x64xbf16>, vector<128x64xf32> -> vector<128x64xf32>
    %c0_27 = arith.constant 0 : index
    %c0_28 = arith.constant 0 : index
    %36 = vector.load %arg11[%c0_27, %c0_28] : memref<1x64xf32, #tpu.memory_space<vmem>>, vector<1x64xf32>
    %37 = vector.broadcast %36 : vector<1x64xf32> to vector<128x64xf32>
    %38 = arith.addf %35, %37 : vector<128x64xf32>
    %cst_29 = arith.constant 0.000000e+00 : f32
    %39 = vector.broadcast %cst_29 : f32 to vector<128x64xf32>
    %40 = arith.maximumf %38, %39 : vector<128x64xf32>
    %41 = arith.truncf %40 : vector<128x64xf32> to vector<128x64xbf16>
    %c0_30 = arith.constant 0 : index
    %c0_31 = arith.constant 0 : index
    %42 = vector.load %arg12[%c0_30, %c0_31] : memref<64x32xbf16, #tpu.memory_space<vmem>>, vector<64x32xbf16>
    %cst_32 = arith.constant dense<0.000000e+00> : vector<128x32xf32>
    %43 = tpu.matmul %41, %42, %cst_32 {dimension_numbers = #tpu.dot_dimension_numbers<[1], [0], [0], [1], [0, 0, 1, 1], [], []>} : vector<128x64xbf16>, vector<64x32xbf16>, vector<128x32xf32> -> vector<128x32xf32>
    %c0_33 = arith.constant 0 : index
    %c0_34 = arith.constant 0 : index
    %44 = vector.load %arg13[%c0_33, %c0_34] : memref<1x32xf32, #tpu.memory_space<vmem>>, vector<1x32xf32>
    %45 = vector.broadcast %44 : vector<1x32xf32> to vector<128x32xf32>
    %46 = arith.addf %43, %45 : vector<128x32xf32>
    %cst_35 = arith.constant 0.000000e+00 : f32
    %47 = vector.broadcast %cst_35 : f32 to vector<128x32xf32>
    %48 = arith.maximumf %46, %47 : vector<128x32xf32>
    %49 = arith.truncf %48 : vector<128x32xf32> to vector<128x32xbf16>
    %c0_36 = arith.constant 0 : index
    %c0_37 = arith.constant 0 : index
    %50 = vector.load %arg14[%c0_36, %c0_37] : memref<32x16xbf16, #tpu.memory_space<vmem>>, vector<32x16xbf16>
    %cst_38 = arith.constant dense<0.000000e+00> : vector<128x16xf32>
    %51 = tpu.matmul %49, %50, %cst_38 {dimension_numbers = #tpu.dot_dimension_numbers<[1], [0], [0], [1], [0, 0, 1, 1], [], []>} : vector<128x32xbf16>, vector<32x16xbf16>, vector<128x16xf32> -> vector<128x16xf32>
    %c0_39 = arith.constant 0 : index
    %c0_40 = arith.constant 0 : index
    %52 = vector.load %arg15[%c0_39, %c0_40] : memref<1x16xf32, #tpu.memory_space<vmem>>, vector<1x16xf32>
    %53 = vector.broadcast %52 : vector<1x16xf32> to vector<128x16xf32>
    %54 = arith.addf %51, %53 : vector<128x16xf32>
    %cst_41 = arith.constant 0.000000e+00 : f32
    %55 = vector.broadcast %cst_41 : f32 to vector<128x16xf32>
    %56 = arith.maximumf %54, %55 : vector<128x16xf32>
    %57 = arith.truncf %56 : vector<128x16xf32> to vector<128x16xbf16>
    %c0_42 = arith.constant 0 : index
    %c0_43 = arith.constant 0 : index
    %58 = vector.load %arg16[%c0_42, %c0_43] : memref<1x16xf32, #tpu.memory_space<vmem>>, vector<1x16xf32>
    %59 = arith.extf %57 : vector<128x16xbf16> to vector<128x16xf32>
    %60 = vector.broadcast %58 : vector<1x16xf32> to vector<128x16xf32>
    %61 = arith.mulf %59, %60 : vector<128x16xf32>
    %cst_44 = arith.constant dense<0.000000e+00> : vector<128xf32>
    %62 = vector.multi_reduction <add>, %61, %cst_44 [1] : vector<128x16xf32> to vector<128xf32>
    %63 = vector.shape_cast %62 : vector<128xf32> to vector<1x128xf32>
    %c0_45 = arith.constant 0 : index
    %c0_46 = arith.constant 0 : index
    %64 = vector.load %arg17[%c0_45, %c0_46] : memref<1x1xf32, #tpu.memory_space<vmem>>, vector<1x1xf32>
    %65 = vector.broadcast %64 : vector<1x1xf32> to vector<1x128xf32>
    %66 = arith.addf %63, %65 : vector<1x128xf32>
    %67 = vector.shape_cast %66 : vector<1x128xf32> to vector<1x1x128xf32>
    %c0_47 = arith.constant 0 : index
    %c0_48 = arith.constant 0 : index
    %c0_49 = arith.constant 0 : index
    %68 = vector.load %arg18[%c0_47, %c0_48, %c0_49] : memref<1x1x128xf32, #tpu.memory_space<vmem>>, vector<1x1x128xf32>
    tpu.vector_store %arg18[%c0_47, %c0_48, %c0_49], %67 {strides = array<i32>} : memref<1x1x128xf32, #tpu.memory_space<vmem>>, vector<1x1x128xf32>,
    return
  }
  func.func @transform_0(%arg0: i32) -> (i32, i32) {
    %c0_i32 = arith.constant 0 : i32
    %c0_i32_0 = arith.constant 0 : i32
    return %arg0, %c0_i32 : i32, i32
  }
  func.func @transform_1(%arg0: i32) -> (i32, i32) {
    %c0_i32 = arith.constant 0 : i32
    %c0_i32_0 = arith.constant 0 : i32
    %c0_i32_1 = arith.constant 0 : i32
    return %c0_i32, %c0_i32_0 : i32, i32
  }
  func.func @transform_2(%arg0: i32) -> (i32, i32) {
    %c0_i32 = arith.constant 0 : i32
    %c0_i32_0 = arith.constant 0 : i32
    %c0_i32_1 = arith.constant 0 : i32
    return %c0_i32, %c0_i32_0 : i32, i32
  }
  func.func @transform_3(%arg0: i32) -> (i32, i32) {
    %c0_i32 = arith.constant 0 : i32
    %c0_i32_0 = arith.constant 0 : i32
    %c0_i32_1 = arith.constant 0 : i32
    return %c0_i32, %c0_i32_0 : i32, i32
  }
  func.func @transform_4(%arg0: i32) -> (i32, i32) {
    %c0_i32 = arith.constant 0 : i32
    %c0_i32_0 = arith.constant 0 : i32
    %c0_i32_1 = arith.constant 0 : i32
    return %c0_i32, %c0_i32_0 : i32, i32
  }
  func.func @transform_5(%arg0: i32) -> (i32, i32) {
    %c0_i32 = arith.constant 0 : i32
    %c0_i32_0 = arith.constant 0 : i32
    %c0_i32_1 = arith.constant 0 : i32
    return %c0_i32, %c0_i32_0 : i32, i32
  }
  func.func @transform_6(%arg0: i32) -> (i32, i32) {
    %c0_i32 = arith.constant 0 : i32
    %c0_i32_0 = arith.constant 0 : i32
    %c0_i32_1 = arith.constant 0 : i32
    return %c0_i32, %c0_i32_0 : i32, i32
  }
  func.func @transform_7(%arg0: i32) -> (i32, i32) {
    %c0_i32 = arith.constant 0 : i32
    %c0_i32_0 = arith.constant 0 : i32
    %c0_i32_1 = arith.constant 0 : i32
    return %c0_i32, %c0_i32_0 : i32, i32
  }
  func.func @transform_8(%arg0: i32) -> (i32, i32) {
    %c0_i32 = arith.constant 0 : i32
    %c0_i32_0 = arith.constant 0 : i32
    %c0_i32_1 = arith.constant 0 : i32
    return %c0_i32, %c0_i32_0 : i32, i32
  }
  func.func @transform_9(%arg0: i32) -> (i32, i32) {
    %c0_i32 = arith.constant 0 : i32
    %c0_i32_0 = arith.constant 0 : i32
    %c0_i32_1 = arith.constant 0 : i32
    return %c0_i32, %c0_i32_0 : i32, i32
  }
  func.func @transform_10(%arg0: i32) -> (i32, i32) {
    %c0_i32 = arith.constant 0 : i32
    %c0_i32_0 = arith.constant 0 : i32
    %c0_i32_1 = arith.constant 0 : i32
    return %c0_i32, %c0_i32_0 : i32, i32
  }
  func.func @transform_11(%arg0: i32) -> (i32, i32) {
    %c0_i32 = arith.constant 0 : i32
    %c0_i32_0 = arith.constant 0 : i32
    %c0_i32_1 = arith.constant 0 : i32
    return %c0_i32, %c0_i32_0 : i32, i32
  }
  func.func @transform_12(%arg0: i32) -> (i32, i32) {
    %c0_i32 = arith.constant 0 : i32
    %c0_i32_0 = arith.constant 0 : i32
    %c0_i32_1 = arith.constant 0 : i32
    return %c0_i32, %c0_i32_0 : i32, i32
  }
  func.func @transform_13(%arg0: i32) -> (i32, i32) {
    %c0_i32 = arith.constant 0 : i32
    %c0_i32_0 = arith.constant 0 : i32
    %c0_i32_1 = arith.constant 0 : i32
    return %c0_i32, %c0_i32_0 : i32, i32
  }
  func.func @transform_14(%arg0: i32) -> (i32, i32) {
    %c0_i32 = arith.constant 0 : i32
    %c0_i32_0 = arith.constant 0 : i32
    %c0_i32_1 = arith.constant 0 : i32
    return %c0_i32, %c0_i32_0 : i32, i32
  }
  func.func @transform_15(%arg0: i32) -> (i32, i32) {
    %c0_i32 = arith.constant 0 : i32
    %c0_i32_0 = arith.constant 0 : i32
    %c0_i32_1 = arith.constant 0 : i32
    return %c0_i32, %c0_i32_0 : i32, i32
  }
  func.func @transform_16(%arg0: i32) -> (i32, i32) {
    %c0_i32 = arith.constant 0 : i32
    %c0_i32_0 = arith.constant 0 : i32
    %c0_i32_1 = arith.constant 0 : i32
    return %c0_i32, %c0_i32_0 : i32, i32
  }
  func.func @transform_17(%arg0: i32) -> (i32, i32, i32) {
    %c0_i32 = arith.constant 0 : i32
    %c0_i32_0 = arith.constant 0 : i32
    %c0_i32_1 = arith.constant 0 : i32
    return %arg0, %c0_i32, %c0_i32_0 : i32, i32, i32
  }
}

</mosaic_0001>

<bundles_post_ra>
// kernel: tpu_custom_call.1
= control target key start
LH: loop header
LB: loop body
LE: loop exit
PB: predicated region body
PF: predicated region fallthrough
CT: control target
= control target key end

     0   :  { %s3904_s0 = inlined_call_operand.vmem [shape: f32[256,250], index: 0, kind: input, shape index: {}]   ;;  %s3905_s1 = inlined_call_operand.vmem [shape: bf16[250,192], index: 1, kind: input, shape index: {}]   ;;  %s3906_s2 = inlined_call_operand.vmem [shape: f32[1,192], index: 2, kind: input, shape index: {}]   ;;  %s3907_s3 = inlined_call_operand.vmem [shape: bf16[192,160], index: 3, kind: input, shape index: {}]   ;;  %s3908_s4 = inlined_call_operand.vmem [shape: f32[1,160], index: 4, kind: input, shape index: {}]   ;;  %s3909_s5 = inlined_call_operand.vmem [shape: bf16[160,128], index: 5, kind: input, shape index: {}]   ;;  %s3910_s6 = inlined_call_operand.vmem [shape: f32[1,128], index: 6, kind: input, shape index: {}]   ;;  %s3911_s7 = inlined_call_operand.vmem [shape: bf16[128,64], index: 7, kind: input, shape index: {}]   ;;  %s3912_s8 = inlined_call_operand.vmem [shape: f32[1,64], index: 8, kind: input, shape index: {}]   ;;  %s3913_s9 = inlined_call_operand.vmem [shape: bf16[64,64], index: 9, kind: input, shape index: {}]   ;;  %s3914_s10 = inlined_call_operand.vmem [shape: f32[1,64], index: 10, kind: input, shape index: {}]   ;;  %s3915_s11 = inlined_call_operand.vmem [shape: bf16[64,32], index: 11, kind: input, shape index: {}]   ;;  %s3916_s12 = inlined_call_operand.vmem [shape: f32[1,32], index: 12, kind: input, shape index: {}]   ;;  %s3917_s13 = inlined_call_operand.vmem [shape: bf16[32,16], index: 13, kind: input, shape index: {}]   ;;  %s3918_s14 = inlined_call_operand.vmem [shape: f32[1,16], index: 14, kind: input, shape index: {}]   ;;  %s3919_s15 = inlined_call_operand.vmem [shape: f32[1,16], index: 15, kind: input, shape index: {}]   ;;  %s3920_s16 = inlined_call_operand.<no memory space> [shape: f32[1,1], index: 16, kind: input, shape index: {}]   ;;  %s3921_s17 = inlined_call_operand.hbm [shape: f32[2,1,128], index: 17, kind: output, shape index: {}]  }
   0x1   :  { %3929 = sst [smem:[#allocation12_spill]] %s3904_s0  ;;  %v22_v0 = vstv %s3920_s16 }
   0x2   :  { %3930 = sst [smem:[#allocation13_spill]] %s3905_s1  ;;  %23 = vst [vmem:[#allocation2] sm:$0x1] %v22_v0 }
   0x3   :  { %24 = vsyncpa [#allocation4], 0 }
   0x4   :  { %26 = vsyncpa [#allocation4 + $0x1], 0  ;;  %s3226_s26 = smov 0   ;;  %s3228_s27 = smov 0  }
   0x5   :  { %s3230_s28 = smov 0   ;;  %s3232_s29 = smov 0  }
   0x6 LB: > { %3931 = sst [smem:[#allocation6_spill]] %s3117_s26  ;;  %s2610_s16 = sadd.s32 4294967295, %s3129_s29   ;;  %s3129_s29 = sphi %s3232_s29, %s3944_s29   ;;  %s3125_s28 = sphi %s3230_s28, %s3946_s28   ;;  %s3121_s27 = sphi %s3228_s27, %s3948_s27   ;;  %s3117_s26 = sphi %s3226_s26, %s3947_s26  }
   0x7   : > { %3932 = sst [smem:[#allocation7_spill]] %s3125_s28  ;;  %s2611_s0 = sadd.s32 4294967294, %s3129_s29  }
   0x8   : > { %3933 = sst [smem:[#allocation8_spill]] %s3129_s29  ;;  %s3249_s30 = sadd.s32 1, %s3129_s29  }
   0x9   : > { %3934 = sst [smem:[#allocation9_spill]] %s3249_s30  ;;  %s401_s18 = sadd.s32 1, %s3125_s28 }
   0xa   : > { %s398_s19 = ssub.s32 %s3129_s29, %s3249_s30  ;;  %p411_p0 = scmp.ne.s32.totalorder %s3125_s28, %s3121_s27 }
   0xb   : > { %p399_p1 = scmp.eq.s32.totalorder %s398_s19, 0  ;;  %p412_p2 = scmp.eq.s32.totalorder %s2610_s16, 1 }
   0xc   : > { %p417_p3 = scmp.ne.s32.totalorder %s3121_s27, %s3117_s26  ;;  %p418_p4 = scmp.eq.s32.totalorder %s2611_s0, 1 }
   0xd   : > { %s3259_s1 = scalar_select %p399_p1, %s3125_s28, %s401_s18  }
   0xe   : > { %p3261_p5 = por %p412_p2, %p411_p0  ;;  %p3265_p6 = por %p418_p4, %p417_p3 }
   0xf   : > { %3935 = sst [smem:[#allocation10_spill]] %s3259_s1  ;;  %p2614_p7 = scmp.ge.s32.totalorder %s3129_s29, 1 }
  0x10   : > { %s3937_s21 = scalar_select %p3265_p6, 1, 0 }
  0x11   : > { %p494_p8 = scmp.lt.s32.totalorder %s3129_s29, 3 }
  0x12   : > { %3938 = sst [smem:[#allocation11_spill]] %s3937_s21 }
  0x13   : > { %p495_p9 = pnand %p2614_p7, %p494_p8 }
  0x14   : > { %s3939_s24 = sld [smem:[#allocation13_spill]] (!%p495_p9)  ;;  %s3286_s22 = sshll.u32 (!%p495_p9), %s2610_s16, 4 }
  0x15   : > { %498 = sbr.rel (%p495_p9) target bundleno = 1771 (0x6eb), region = 88  ;;  %p547_p10 = scmp.lt.s32.totalorder (!%p495_p9), %s3286_s22, 31 }
  0x16   : > { %s3940_s1 = sld [smem:[#allocation12_spill]] (!%p495_p9)  ;;  %s544_s21 = sand.u32 (!%p495_p9), 1, %s3121_s27  }
  0x17   : > { %s545_s19 = scalar_lea.vmem (!%p495_p9), [#allocation3], %s544_s21  ;;  %s2544_s0 = scalar_lea.sflag (!%p495_p9), [#allocation4], %s544_s21 }
  0x1a   : > { %v2957_v1 = vld [vmem:[%s3939_s24 + $0x74] ss:$8 sps:$4 sm:$0xff]   ;;  %v2959_v2 = vld [vmem:[%s3939_s24 + $0x70] ss:$8 sps:$4 sm:$0xff]   ;;  %v2960_v3 = vld [vmem:[%s3939_s24 + $0x64] ss:$8 sps:$4 sm:$0xff]  }
  0x1b   : > { %836 = vmatprep.subr.bf16.mxu0 %v2957_v1  ;;  %v2962_v4 = vld [vmem:[%s3939_s24 + $0x60] ss:$8 sps:$4 sm:$0xff]   ;;  %v2963_v5 = vld [vmem:[%s3939_s24 + $0x54] ss:$8 sps:$4 sm:$0xff]   ;;  %v2965_v6 = vld [vmem:[%s3939_s24 + $0x50] ss:$8 sps:$4 sm:$0xff]  }
  0x1c   : > { %837 = vmatpush1.bf16.msra.mxu0 %v2959_v2  ;;  %v2966_v7 = vld [vmem:[%s3939_s24 + $0x44] ss:$8 sps:$4 sm:$0xff]   ;;  %v2968_v8 = vld [vmem:[%s3939_s24 + $0x40] ss:$8 sps:$4 sm:$0xff]   ;;  %s548_s16 = scalar_select %p547_p10, %s3286_s22, 31  ;;  %vm804_vm0 = vcmask 998400  }
  0x1d   : > { %838 = vmatprep.subr.bf16.mxu0 %v2960_v3  ;;  %v2969_v9 = vld [vmem:[%s3939_s24 + $0x34] ss:$8 sps:$4 sm:$0xff]   ;;  %v2971_v10 = vld [vmem:[%s3939_s24 + $0x30] ss:$8 sps:$4 sm:$0xff]   ;;  %v2972_v11 = vld [vmem:[%s3939_s24 + $0x24] ss:$8 sps:$4 sm:$0xff]  }
  0x1e   : > { %s2760_s25 = sshll.u32 %s548_s16, 4  ;;  %v2974_v12 = vld [vmem:[%s3939_s24 + $0x20] ss:$8 sps:$4 sm:$0xff]   ;;  %v2975_v13 = vld [vmem:[%s3939_s24 + $0x14] ss:$8 sps:$4 sm:$0xff]   ;;  %vm829_vm1 = vcmask 1044480  }
  0x1f   : > { %s3311_s29 = scalar_lea.vmem %s3940_s1, %s2760_s25  ;;  %v2977_v17 = vld [vmem:[%s3939_s24 + $0x10] ss:$8 sps:$4 sm:$0xff]   ;;  %v2978_v18 = vld [vmem:[%s3939_s24 + $0x4] ss:$8 sps:$4 sm:$0xff]   ;;  %v2980_v19 = vld [vmem:[%s3939_s24] ss:$8 sps:$4 sm:$0xff]   ;;  %s3867_s25 = scalar_lea.hbm %s3921_s17, %s3286_s22 }
  0x20   : > { %839 = vmatpush1.bf16.msra.mxu0 %v2962_v4  ;;  %v555_v14 = vld [vmem:[%s3311_s29 + $0x8] sm:$0xff]  ;;  %v557_v15 = vld [vmem:[%s3311_s29 + $0x18] sm:$0xff]  ;;  %v554_v52 = vld [vmem:[%s3311_s29] sm:$0xff]  ;;  %vm1153_vm2 = vcmask 523264   ;;  %vm1426_vm3 = vcmask 261120   ;;  %vm2339_vm4 = vcmask 130048  }
  0x21   : > { %840 = vmatprep.subr.bf16.mxu0 %v2963_v5  ;;  %v587_v16 = vpack.c.bf16 %v557_v15, %v555_v14  ;;  %v2981_v20 = vld [vmem:[%s3939_s24 + $0xf4] ss:$8 sps:$4 sm:$0x1f]   ;;  %v2983_v21 = vld [vmem:[%s3939_s24 + $0xf0] ss:$8 sps:$4 sm:$0x1f]  }
  0x22   : > { %v2984_v22 = vld [vmem:[%s3939_s24 + $0xe4] ss:$8 sps:$4 sm:$0xff]   ;;  %v831_v23 = vsel %vm829_vm1, %v2983_v21, 0  ;;  %v3005_v24 = vld [vmem:[%s3907_s3 + $0x74] ss:$8 sps:$4 sm:$0xff]   ;;  %vm2441_vm5 = vcmask 130112  }
  0x23   : > { %2651 = vmatprep.mubr.msk.bf16.mxu0 %vm804_vm0, %v587_v16  ;;  %v3007_v25 = vld [vmem:[%s3907_s3 + $0x70] ss:$8 sps:$4 sm:$0xff]   ;;  %v2986_v26 = vld [vmem:[%s3939_s24 + $0xe0] ss:$8 sps:$4 sm:$0xff]   ;;  %1178 = vmatprep.subr.bf16.mxu1 %v3005_v24  ;;  %v3008_v27 = vld [vmem:[%s3907_s3 + $0x64] ss:$8 sps:$4 sm:$0xff]  }
  0x24   : > { %841 = vmatpush1.bf16.msra.mxu0 %v2965_v6  ;;  %v2987_v28 = vld [vmem:[%s3939_s24 + $0xd4] ss:$8 sps:$4 sm:$0xff]   ;;  %1179 = vmatpush1.bf16.msra.mxu1 %v3007_v25  ;;  %v3010_v29 = vld [vmem:[%s3907_s3 + $0x60] ss:$8 sps:$4 sm:$0xff]   ;;  %v2989_v31 = vld [vmem:[%s3939_s24 + $0xd0] ss:$8 sps:$4 sm:$0xff]  }
  0x25   : > { %842 = vmatprep.subr.bf16.mxu0 %v2966_v7  ;;  %1180 = vmatprep.subr.bf16.mxu1 %v3008_v27  ;;  %v3011_v30 = vld [vmem:[%s3907_s3 + $0x54] ss:$8 sps:$4 sm:$0xff]   ;;  %v2990_v32 = vld [vmem:[%s3939_s24 + $0xc4] ss:$8 sps:$4 sm:$0xff]   ;;  %v3013_v33 = vld [vmem:[%s3907_s3 + $0x50] ss:$8 sps:$4 sm:$0xff]  }
  0x26   : > { %v3014_v34 = vld [vmem:[%s3907_s3 + $0x44] ss:$8 sps:$4 sm:$0xff]   ;;  %v2992_v35 = vld [vmem:[%s3939_s24 + $0xc0] ss:$8 sps:$4 sm:$0xff]   ;;  %v2993_v36 = vld [vmem:[%s3939_s24 + $0xb4] ss:$8 sps:$4 sm:$0xff]  }
  0x27   : > { %v3016_v37 = vld [vmem:[%s3907_s3 + $0x40] ss:$8 sps:$4 sm:$0xff]   ;;  %v3017_v38 = vld [vmem:[%s3907_s3 + $0x34] ss:$8 sps:$4 sm:$0xff]   ;;  %v2995_v39 = vld [vmem:[%s3939_s24 + $0xb0] ss:$8 sps:$4 sm:$0xff]  }
  0x28   : > { %843 = vmatpush1.bf16.msra.mxu0 %v2968_v8  ;;  %1181 = vmatpush1.bf16.msra.mxu1 %v3010_v29  ;;  %v3019_v40 = vld [vmem:[%s3907_s3 + $0x30] ss:$8 sps:$4 sm:$0xff]   ;;  %v2996_v41 = vld [vmem:[%s3939_s24 + $0xa4] ss:$8 sps:$4 sm:$0xff]   ;;  %v2998_v43 = vld [vmem:[%s3939_s24 + $0xa0] ss:$8 sps:$4 sm:$0xff]  }
  0x29   : > { %844 = vmatprep.subr.bf16.mxu0 %v2969_v9  ;;  %1182 = vmatprep.subr.bf16.mxu1 %v3011_v30  ;;  %v3020_v42 = vld [vmem:[%s3907_s3 + $0x24] ss:$8 sps:$4 sm:$0xff]   ;;  %v3022_v44 = vld [vmem:[%s3907_s3 + $0x20] ss:$8 sps:$4 sm:$0xff]   ;;  %v2999_v45 = vld [vmem:[%s3939_s24 + $0x94] ss:$8 sps:$4 sm:$0xff]  }
  0x2a   : > { %v3023_v46 = vld [vmem:[%s3907_s3 + $0x14] ss:$8 sps:$4 sm:$0xff]   ;;  %v3001_v47 = vld [vmem:[%s3939_s24 + $0x90] ss:$8 sps:$4 sm:$0xff]   ;;  %v3002_v49 = vld [vmem:[%s3939_s24 + $0x84] ss:$8 sps:$4 sm:$0xff]  }
  0x2b   : > { %v3025_v48 = vld [vmem:[%s3907_s3 + $0x10] ss:$8 sps:$4 sm:$0xff]   ;;  %v3026_v50 = vld [vmem:[%s3907_s3 + $0x4] ss:$8 sps:$4 sm:$0xff]   ;;  %v3004_v51 = vld [vmem:[%s3939_s24 + $0x80] ss:$8 sps:$4 sm:$0xff]  }
  0x2c   : > { %845 = vmatpush1.bf16.msra.mxu0 %v2971_v10  ;;  %1183 = vmatpush1.bf16.msra.mxu1 %v3013_v33  ;;  %v556_v53 = vld [vmem:[%s3311_s29 + $0x10] sm:$0xff]  ;;  %v3028_v54 = vld [vmem:[%s3907_s3] ss:$8 sps:$4 sm:$0xff]   ;;  %v561_v56 = vld [vmem:[%s3311_s29 + $0x38] sm:$0xff]  ;;  %vm2448_vm6 = vcmask 195712   ;;  %vm2455_vm7 = vcmask 261312  }
  0x2d   : > { %846 = vmatprep.subr.bf16.mxu0 %v2972_v11  ;;  %1184 = vmatprep.subr.bf16.mxu1 %v3014_v34  ;;  %v559_v55 = vld [vmem:[%s3311_s29 + $0x28] sm:$0xff]  ;;  %v3029_v57 = vld [vmem:[%s3907_s3 + $0xb4] ss:$8 sps:$4 sm:$0xff]   ;;  %v3031_v58 = vld [vmem:[%s3907_s3 + $0xb0] ss:$8 sps:$4 sm:$0xff]   ;;  %v586_v59 = vpack.c.bf16 %v556_v53, %v554_v52  ;;  %vm2462_vm8 = vcmask 326912  }
  0x2e   : > { %v589_v60 = vpack.c.bf16 %v561_v56, %v559_v55  ;;  %v558_v61 = vld [vmem:[%s3311_s29 + $0x20] sm:$0xff]  ;;  %v560_v62 = vld [vmem:[%s3311_s29 + $0x30] sm:$0xff]  ;;  %v563_v63 = vld [vmem:[%s3311_s29 + $0x48] sm:$0xff]  ;;  %vm2469_vm9 = vcmask 392512   ;;  %vm2476_vm10 = vcmask 458112   ;;  %vm2483_vm11 = vcmask 523712  }
  0x2f   : > { %v565_v0 = vld [vmem:[%s3311_s29 + $0x58] sm:$0xff]  ;;  %v588_v1 = vpack.c.bf16 %v560_v62, %v558_v61  ;;  %v562_v3 = vld [vmem:[%s3311_s29 + $0x40] sm:$0xff]  ;;  %v564_v4 = vld [vmem:[%s3311_s29 + $0x50] sm:$0xff]  ;;  %vm2490_vm12 = vcmask 589312   ;;  %vm2497_vm13 = vcmask 654912   ;;  %vm2504_vm14 = vcmask 720512  }
  0x30   : > { %847 = vmatpush1.bf16.msra.mxu0 %v2974_v12  ;;  %1185 = vmatpush1.bf16.msra.mxu1 %v3016_v37  ;;  %v591_v2 = vpack.c.bf16 %v565_v0, %v563_v63  ;;  %v567_v5 = vld [vmem:[%s3311_s29 + $0x68] sm:$0xff]  ;;  %v569_v6 = vld [vmem:[%s3311_s29 + $0x78] sm:$0xff]  ;;  %v590_v7 = vpack.c.bf16 %v564_v4, %v562_v3  ;;  %v566_v9 = vld [vmem:[%s3311_s29 + $0x60] sm:$0xff]  ;;  %vm2511_vm15 = vcmask 786112   ;;  %s2556_s16 = sshll.u32 %s545_s19, 4  ;;  %s2557_s16 = int_to_ptr.vmem [resolvable:$true] %s2556_s16 }
  0x31   : > { %848 = vmatprep.subr.bf16.mxu0 %v2975_v13  ;;  %1186 = vmatprep.subr.bf16.mxu1 %v3017_v38  ;;  %v593_v8 = vpack.c.bf16 %v569_v6, %v567_v5  ;;  %v568_v10 = vld [vmem:[%s3311_s29 + $0x70] sm:$0xff]  ;;  %v571_v11 = vld [vmem:[%s3311_s29 + $0x88] sm:$0xff]  ;;  %v573_v12 = vld [vmem:[%s3311_s29 + $0x98] sm:$0xff]  ;;  %s3069_s18 = scalar_lea.vmem %s2557_s16, 16 }
  0x32   : > { %v592_v13 = vpack.c.bf16 %v568_v10, %v566_v9  ;;  %v595_v14 = vpack.c.bf16 %v573_v12, %v571_v11  ;;  %v570_v15 = vld [vmem:[%s3311_s29 + $0x80] sm:$0xff]  ;;  %v572_v16 = vld [vmem:[%s3311_s29 + $0x90] sm:$0xff]  ;;  %v581_v24 = vld [vmem:[%s3311_s29 + $0xd8] sm:$0xff]  ;;  %p3070_p11 = scmp.ne.s32.totalorder %s2557_s16, %s3069_s18 }
  0x33   : > { %v574_v21 = vld [vmem:[%s3311_s29 + $0xa0] sm:$0xff]  ;;  %v583_v29 = vld [vmem:[%s3311_s29 + $0xe8] sm:$0xff]  ;;  %v585_v30 = vld [vmem:[%s3311_s29 + $0xf8] sm:$0xff] }
  0x34   : > { %849 = vmatpush1.bf16.msra.mxu0 %v2977_v17  ;;  %1187 = vmatpush1.bf16.msra.mxu1 %v3019_v40  ;;  %v575_v17 = vld [vmem:[%s3311_s29 + $0xa8] sm:$0xff]  ;;  %v578_v27 = vld [vmem:[%s3311_s29 + $0xc0] sm:$0xff]  ;;  %v584_v34 = vld [vmem:[%s3311_s29 + $0xf0] sm:$0xff]  ;;  %p3071_p12 = pnand %p3070_p11, %p3261_p5 }
  0x35   : > { %850 = vmatprep.subr.bf16.mxu0 %v2978_v18  ;;  %1188 = vmatprep.subr.bf16.mxu1 %v3020_v42  ;;  %v577_v18 = vld [vmem:[%s3311_s29 + $0xb8] sm:$0xff]  ;;  %v582_v33 = vld [vmem:[%s3311_s29 + $0xe0] sm:$0xff]  ;;  %v3131_v42 = vmov 0   ;;  %v3042_v9 = vld [vmem:[%s3909_s5 + $0x30] sm:$0xff]  }
  0x36   : > { %v3034_v37 = vld [vmem:[%s3907_s3 + $0xa0] ss:$8 sps:$4 sm:$0xff]   ;;  %v3035_v38 = vld [vmem:[%s3907_s3 + $0x94] ss:$8 sps:$4 sm:$0xff]   ;;  %v3038_v40 = vld [vmem:[%s3907_s3 + $0x84] ss:$8 sps:$4 sm:$0xff]   ;;  %2955 = vset.pattern.permute.xlu1 %v3131_v42  ;;  %2956 = vset.pattern.permute.xlu0 %v3131_v42  ;;  %p3072_p13 = pneg %p3071_p12 }
  0x38   : > { %851 = vmatpush1.bf16.msra.mxu0 %v2980_v19  ;;  %1189 = vmatpush1.bf16.msra.mxu1 %v3022_v44  ;;  %v594_v19 = vpack.c.bf16 %v572_v16, %v570_v15 }
  0x39   : > { %2650 = vmatprep.subr.msk.bf16.mxu0 %vm829_vm1, %v2981_v20  ;;  %1190 = vmatprep.subr.bf16.mxu1 %v3023_v46  ;;  %v597_v20 = vpack.c.bf16 %v577_v18, %v575_v17  ;;  %v3043_v17 = vld [vmem:[%s3909_s5 + $0x28] sm:$0xff]   ;;  %vm2525_vm1 = vcmask 917312  }
  0x3c   : > { %853 = vmatpush2.bf16.msra.mxu0 %v831_v23  ;;  %1191 = vmatpush1.bf16.msra.mxu1 %v3025_v48  ;;  %v579_v23 = vld [vmem:[%s3311_s29 + $0xc8] sm:$0xff] }
  0x3d   : > { %854 = vmatprep.subr.bf16.mxu0 %v2984_v22  ;;  %1192 = vmatprep.subr.bf16.mxu1 %v3026_v50  ;;  %v576_v22 = vld [vmem:[%s3311_s29 + $0xb0] sm:$0xff] }
  0x3e   : > { %v596_v25 = vpack.c.bf16 %v576_v22, %v574_v21 }
  0x40   : > { %855 = vmatpush2.bf16.msra.mxu0 %v2986_v26  ;;  %1193 = vmatpush1.bf16.msra.mxu1 %v3028_v54  ;;  %v599_v26 = vpack.c.bf16 %v581_v24, %v579_v23 }
  0x41   : > { %856 = vmatprep.subr.bf16.mxu0 %v2987_v28  ;;  %1202 = vmatprep.subr.bf16.mxu1 %v3029_v57  ;;  %v580_v28 = vld [vmem:[%s3311_s29 + $0xd0] sm:$0xff]  ;;  %s3132_s29 = smov [#allocation3]  }
  0x42   : > { %s3073_s28 = sshll.u32 %s3132_s29, 4  ;;  %s3074_s28 = int_to_ptr.vmem [resolvable:$false] %s3073_s28 }
  0x43   : > { %s3075_s1 = scalar_lea.vmem %s3074_s28, 32  ;;  %p3076_p0 = scmp.lt.s32.totalorder %s2557_s16, %s3074_s28 }
  0x44   : > { %857 = vmatpush2.bf16.msra.mxu0 %v2989_v31  ;;  %1203 = vmatpush2.bf16.msra.mxu1 %v3031_v58  ;;  %v598_v31 = vpack.c.bf16 %v580_v28, %v578_v27  ;;  %p3077_p1 = scmp.lt.s32.totalorder %s3075_s1, %s3069_s18 }
  0x45   : > { %858 = vmatprep.subr.bf16.mxu0 %v2990_v32  ;;  %v601_v32 = vpack.c.bf16 %v585_v30, %v583_v29 }
  0x46   : > { %p3078_p2 = por %p3077_p1, %p3076_p0 }
  0x48   : > { %859 = vmatpush2.bf16.msra.mxu0 %v2992_v35  ;;  %v600_v35 = vpack.c.bf16 %v584_v34, %v582_v33  ;;  %v3045_v33 = vld [vmem:[%s3909_s5 + $0x18] sm:$0xff]   ;;  %p3079_p3 = pnand %p3078_p2, %p3072_p13 }
  0x49   : > { %860 = vmatprep.subr.bf16.mxu0 %v2993_v36  ;;  %v3032_v36 = vld [vmem:[%s3907_s3 + $0xa4] ss:$8 sps:$4 sm:$0xff]  }
  0x4a   : > { %1204 = vmatprep.subr.bf16.mxu1 %v3032_v36 }
  0x4b   : > { %1205 = vmatpush2.bf16.msra.mxu1 %v3034_v37 }
  0x4c   : > { %861 = vmatpush2.bf16.msra.mxu0 %v2995_v39  ;;  %v3037_v39 = vld [vmem:[%s3907_s3 + $0x90] ss:$8 sps:$4 sm:$0xff]   ;;  %1206 = vmatprep.subr.bf16.mxu1 %v3035_v38 }
  0x4d   : > { %862 = vmatprep.subr.bf16.mxu0 %v2996_v41  ;;  %v3040_v41 = vld [vmem:[%s3907_s3 + $0x80] ss:$8 sps:$4 sm:$0xff]  }
  0x4f   : > { %1207 = vmatpush2.bf16.msra.mxu1 %v3037_v39 }
  0x50   : > { %863 = vmatpush2.bf16.msra.mxu0 %v2998_v43  ;;  %1208 = vmatprep.subr.bf16.mxu1 %v3038_v40  ;;  %v636_v43 = vlaneseq }
  0x51   : > { %864 = vmatprep.subr.bf16.mxu0 %v2999_v45 }
  0x52   : > { %v3492_v44 = vshrl.u32 %v636_v43, 7 }
  0x53   : > { %1209 = vmatpush2.bf16.msra.mxu1 %v3040_v41  ;;  %v3046_v41 = vld [vmem:[%s3909_s5 + $0x10] sm:$0xff]  }
  0x54   : > { %865 = vmatpush2.bf16.msra.mxu0 %v3001_v47  ;;  %1451 = vmatprep.subr.bf16.mxu1 %v3131_v42  ;;  %v642_v45 = vsub.s32 1, %v3492_v44  ;;  %v3496_v46 = vsub.s32 0, %v3492_v44  ;;  %v634_v47 = vld [vmem:[%s3906_s2] sm:$0x3] }
  0x55   : > { %866 = vmatprep.subr.bf16.mxu0 %v3002_v49 }
  0x56   : > { %v3503_v49 = vrot.slane %v634_v47, %v642_v45  ;;  %v3506_v50 = vrot.slane %v634_v47, %v3496_v46 }
  0x58   : > { %867 = vmatpush2.bf16.msra.mxu0 %v3004_v51 }
  0x5b   : > { %869 = vmatmul.mubr.bf16.vlgmr.msra.gmra.mxu0 %v586_v59 }
  0x5c   : > { %2652 = vmatprep.mubr.msk.bf16.mxu0 %vm804_vm0, %v589_v60 }
  0x63   : > { %879 = vmatmul.mubr.bf16.gmra.mxu0 %v588_v1  ;;  %v3041_v1 = vld [vmem:[%s3909_s5 + $0x38] sm:$0xff]  }
  0x64   : > { %2653 = vmatprep.mubr.msk.bf16.mxu0 %vm804_vm0, %v591_v2 }
  0x6b   : > { %889 = vmatmul.mubr.bf16.gmra.mxu0 %v590_v7 }
  0x6c   : > { %2654 = vmatprep.mubr.msk.bf16.mxu0 %vm804_vm0, %v593_v8 }
  0x73   : > { %899 = vmatmul.mubr.bf16.gmra.mxu0 %v592_v13 }
  0x74   : > { %2655 = vmatprep.mubr.msk.bf16.mxu0 %vm804_vm0, %v595_v14 }
  0x7b   : > { %909 = vmatmul.mubr.bf16.gmra.mxu0 %v594_v19 }
  0x7c   : > { %2656 = vmatprep.mubr.msk.bf16.mxu0 %vm804_vm0, %v597_v20 }
  0x83   : > { %919 = vmatmul.mubr.bf16.gmra.mxu0 %v596_v25  ;;  %v3044_v25 = vld [vmem:[%s3909_s5 + $0x20] sm:$0xff]  }
  0x84   : > { %2657 = vmatprep.mubr.msk.bf16.mxu0 %vm804_vm0, %v599_v26 }
  0x8b   : > { %929 = vmatmul.mubr.bf16.gmra.mxu0 %v598_v31 }
  0x8c   : > { %2658 = vmatprep.mubr.msk.bf16.mxu0 %vm804_vm0, %v601_v32  ;;  %vm2518_vm0 = vcmask 851712  }
  0x93   : > { %939 = vmatmul.mubr.bf16.gmra.mxu0 %v600_v35 }
 0x11b   : > { %v870_v48 = vpop.f32.mrf.mxu0 }
 0x11c   : > { %v871_v55 = vadd.f32 %v870_v48, %v3506_v50 }
 0x11d   : > { %v872_v51 = vpop.f32.mrf.mxu0 }
 0x11e   : > { %v873_v53 = vadd.f32 %v872_v51, %v3503_v49  ;;  %v949_v62 = vmax.f32 %v871_v55, 0.0 }
 0x11f   : > { %v874_v52 = vpop.f32.mrf.mxu0 }
 0x120   : > { %v875_v54 = vadd.f32 %v874_v52, %v3506_v50  ;;  %v950_v60 = vmax.f32 %v873_v53, 0.0 }
 0x121   : > { %v876_v56 = vpop.f32.mrf.mxu0 }
 0x122   : > { %v877_v57 = vadd.f32 %v876_v56, %v3503_v49  ;;  %v951_v58 = vmax.f32 %v875_v54, 0.0 }
 0x123   : > { %v880_v59 = vpop.f32.mrf.mxu0 }
 0x124   : > { %v952_v61 = vmax.f32 %v877_v57, 0.0  ;;  %v981_v2 = vpack.c.bf16 %v951_v58, %v949_v62  ;;  %v881_v6 = vadd.f32 %v880_v59, %v3506_v50  ;;  %v3047_v58 = vld [vmem:[%s3909_s5 + $0x8] sm:$0xff]  }
 0x125   : > { %v882_v63 = vpop.f32.mrf.mxu0 }
 0x126   : > { %v982_v0 = vpack.c.bf16 %v952_v61, %v950_v60  ;;  %v883_v4 = vadd.f32 %v882_v63, %v3503_v49  ;;  %v953_v14 = vmax.f32 %v881_v6, 0.0 }
 0x127   : > { %v884_v3 = vpop.f32.mrf.mxu0 }
 0x128   : > { %v885_v5 = vadd.f32 %v884_v3, %v3506_v50  ;;  %2683 = vmatprep.mubr.msk.bf16.mxu1 %vm1153_vm2, %v982_v0  ;;  %v954_v12 = vmax.f32 %v883_v4, 0.0  ;;  %v3048_v3 = vld [vmem:[%s3909_s5] sm:$0xff]  }
 0x129   : > { %v886_v7 = vpop.f32.mrf.mxu0  ;;  %1211 = vmatmul.mubr.bf16.vlgmr.msra.gmra.mxu1 %v981_v2 }
 0x12a   : > { %v887_v8 = vadd.f32 %v886_v7, %v3503_v49  ;;  %1452 = vmatpush1.bf16.msra.mxu1 %v3041_v1  ;;  %v955_v10 = vmax.f32 %v885_v5, 0.0 }
 0x12b   : > { %v890_v11 = vpop.f32.mrf.mxu0  ;;  %1453 = vmatprep.subr.bf16.mxu1 %v3131_v42 }
 0x12c   : > { %v956_v13 = vmax.f32 %v887_v8, 0.0  ;;  %v983_v18 = vpack.c.bf16 %v955_v10, %v953_v14  ;;  %v891_v22 = vadd.f32 %v890_v11, %v3506_v50 }
 0x12d   : > { %v892_v15 = vpop.f32.mrf.mxu0 }
 0x12e   : > { %v984_v16 = vpack.c.bf16 %v956_v13, %v954_v12  ;;  %1454 = vmatpush1.bf16.msra.mxu1 %v3042_v9  ;;  %v893_v20 = vadd.f32 %v892_v15, %v3503_v49  ;;  %v957_v30 = vmax.f32 %v891_v22, 0.0 }
 0x12f   : > { %v894_v19 = vpop.f32.mrf.mxu0  ;;  %1455 = vmatprep.subr.bf16.mxu1 %v3131_v42 }
 0x130   : > { %v895_v21 = vadd.f32 %v894_v19, %v3506_v50  ;;  %2684 = vmatprep.mubr.msk.bf16.mxu1 %vm1153_vm2, %v984_v16  ;;  %v958_v28 = vmax.f32 %v893_v20, 0.0 }
 0x131   : > { %v896_v23 = vpop.f32.mrf.mxu0  ;;  %1221 = vmatmul.mubr.bf16.gmra.mxu1 %v983_v18 }
 0x132   : > { %v897_v24 = vadd.f32 %v896_v23, %v3503_v49  ;;  %1456 = vmatpush1.bf16.msra.mxu1 %v3043_v17  ;;  %v959_v26 = vmax.f32 %v895_v21, 0.0 }
 0x133   : > { %v900_v27 = vpop.f32.mrf.mxu0  ;;  %1457 = vmatprep.subr.bf16.mxu1 %v3131_v42 }
 0x134   : > { %v960_v29 = vmax.f32 %v897_v24, 0.0  ;;  %v985_v34 = vpack.c.bf16 %v959_v26, %v957_v30  ;;  %v901_v38 = vadd.f32 %v900_v27, %v3506_v50 }
 0x135   : > { %v902_v31 = vpop.f32.mrf.mxu0 }
 0x136   : > { %v986_v32 = vpack.c.bf16 %v960_v29, %v958_v28  ;;  %1458 = vmatpush1.bf16.msra.mxu1 %v3044_v25  ;;  %v903_v36 = vadd.f32 %v902_v31, %v3503_v49  ;;  %v961_v53 = vmax.f32 %v901_v38, 0.0 }
 0x137   : > { %v904_v35 = vpop.f32.mrf.mxu0  ;;  %1459 = vmatprep.subr.bf16.mxu1 %v3131_v42 }
 0x138   : > { %v905_v37 = vadd.f32 %v904_v35, %v3506_v50  ;;  %2685 = vmatprep.mubr.msk.bf16.mxu1 %vm1153_vm2, %v986_v32  ;;  %v962_v51 = vmax.f32 %v903_v36, 0.0 }
 0x139   : > { %v906_v39 = vpop.f32.mrf.mxu0  ;;  %1231 = vmatmul.mubr.bf16.gmra.mxu1 %v985_v34 }
 0x13a   : > { %v907_v40 = vadd.f32 %v906_v39, %v3503_v49  ;;  %1460 = vmatpush1.bf16.msra.mxu1 %v3045_v33  ;;  %v963_v47 = vmax.f32 %v905_v37, 0.0 }
 0x13b   : > { %v910_v48 = vpop.f32.mrf.mxu0  ;;  %1461 = vmatprep.subr.bf16.mxu1 %v3131_v42 }
 0x13c   : > { %v964_v52 = vmax.f32 %v907_v40, 0.0  ;;  %v911_v54 = vadd.f32 %v910_v48, %v3506_v50  ;;  %v987_v59 = vpack.c.bf16 %v963_v47, %v961_v53 }
 0x13d   : > { %v912_v55 = vpop.f32.mrf.mxu0 }
 0x13e   : > { %v988_v56 = vpack.c.bf16 %v964_v52, %v962_v51  ;;  %v913_v57 = vadd.f32 %v912_v55, %v3503_v49  ;;  %1462 = vmatpush1.bf16.msra.mxu1 %v3046_v41  ;;  %v965_v62 = vmax.f32 %v911_v54, 0.0 }
 0x13f   : > { %v914_v60 = vpop.f32.mrf.mxu0  ;;  %1463 = vmatprep.subr.bf16.mxu1 %v3131_v42 }
 0x140   : > { %v915_v61 = vadd.f32 %v914_v60, %v3506_v50  ;;  %2686 = vmatprep.mubr.msk.bf16.mxu1 %vm1153_vm2, %v988_v56  ;;  %v966_v0 = vmax.f32 %v913_v57, 0.0  ;;  %v3049_v56 = vld [vmem:[%s3909_s5 + $0x48] sm:$0xff]   ;;  %v3052_v57 = vld [vmem:[%s3911_s7 + $0x30] sm:$0xff]   ;;  %v1021_v60 = vld [vmem:[%s3908_s4] sm:$0x3] }
 0x141   : > { %v916_v63 = vpop.f32.mrf.mxu0  ;;  %1241 = vmatmul.mubr.bf16.gmra.mxu1 %v987_v59  ;;  %v3055_v59 = vld [vmem:[%s3911_s7 + $0x18] sm:$0xff]  }
 0x142   : > { %v967_v1 = vmax.f32 %v915_v61, 0.0  ;;  %v917_v2 = vadd.f32 %v916_v63, %v3503_v49  ;;  %1464 = vmatpush1.bf16.msra.mxu1 %v3047_v58  ;;  %v3054_v58 = vld [vmem:[%s3911_s7 + $0x20] sm:$0xff]   ;;  %v3610_v63 = vrot.slane %v1021_v60, %v3496_v46 }
 0x143   : > { %v920_v4 = vpop.f32.mrf.mxu0  ;;  %1465 = vmatprep.subr.bf16.mxu1 %v3131_v42 }
 0x144   : > { %v968_v5 = vmax.f32 %v917_v2, 0.0  ;;  %v989_v6 = vpack.c.bf16 %v967_v1, %v965_v62  ;;  %v921_v7 = vadd.f32 %v920_v4, %v3506_v50  ;;  %v3607_v62 = vrot.slane %v1021_v60, %v642_v45 }
 0x145   : > { %v922_v8 = vpop.f32.mrf.mxu0 }
 0x146   : > { %v990_v9 = vpack.c.bf16 %v968_v5, %v966_v0  ;;  %v923_v10 = vadd.f32 %v922_v8, %v3503_v49  ;;  %1466 = vmatpush1.bf16.msra.mxu1 %v3048_v3  ;;  %v969_v13 = vmax.f32 %v921_v7, 0.0 }
 0x147   : > { %v924_v11 = vpop.f32.mrf.mxu0  ;;  %1479 = vmatprep.subr.bf16.mxu1 %v3131_v42 }
 0x148   : > { %v925_v12 = vadd.f32 %v924_v11, %v3506_v50  ;;  %2687 = vmatprep.mubr.msk.bf16.mxu1 %vm1153_vm2, %v990_v9  ;;  %v970_v15 = vmax.f32 %v923_v10, 0.0 }
 0x149   : > { %v926_v14 = vpop.f32.mrf.mxu0  ;;  %1251 = vmatmul.mubr.bf16.gmra.mxu1 %v989_v6 }
 0x14a   : > { %v971_v16 = vmax.f32 %v925_v12, 0.0  ;;  %v927_v17 = vadd.f32 %v926_v14, %v3503_v49  ;;  %1480 = vmatpush2.bf16.msra.mxu1 %v3049_v56 }
 0x14b   : > { %v930_v18 = vpop.f32.mrf.mxu0  ;;  %1481 = vmatprep.subr.bf16.mxu1 %v3131_v42  ;;  %v3053_v42 = vld [vmem:[%s3911_s7 + $0x28] sm:$0xff]  }
 0x14c   : > { %v972_v19 = vmax.f32 %v927_v17, 0.0  ;;  %v991_v20 = vpack.c.bf16 %v971_v16, %v969_v13  ;;  %v931_v21 = vadd.f32 %v930_v18, %v3506_v50 }
 0x14d   : > { %v932_v22 = vpop.f32.mrf.mxu0 }
 0x14e   : > { %v992_v23 = vpack.c.bf16 %v972_v19, %v970_v15  ;;  %v933_v24 = vadd.f32 %v932_v22, %v3503_v49  ;;  %v973_v27 = vmax.f32 %v931_v21, 0.0 }
 0x14f   : > { %v934_v25 = vpop.f32.mrf.mxu0 }
 0x150   : > { %v935_v26 = vadd.f32 %v934_v25, %v3506_v50  ;;  %2688 = vmatprep.mubr.msk.bf16.mxu1 %vm1153_vm2, %v992_v23  ;;  %v974_v29 = vmax.f32 %v933_v24, 0.0 }
 0x151   : > { %v936_v28 = vpop.f32.mrf.mxu0  ;;  %1261 = vmatmul.mubr.bf16.gmra.mxu1 %v991_v20 }
 0x152   : > { %v975_v30 = vmax.f32 %v935_v26, 0.0  ;;  %v937_v31 = vadd.f32 %v936_v28, %v3503_v49 }
 0x153   : > { %v940_v32 = vpop.f32.mrf.mxu0 }
 0x154   : > { %v976_v33 = vmax.f32 %v937_v31, 0.0  ;;  %v993_v34 = vpack.c.bf16 %v975_v30, %v973_v27  ;;  %v941_v35 = vadd.f32 %v940_v32, %v3506_v50 }
 0x155   : > { %v942_v36 = vpop.f32.mrf.mxu0 }
 0x156   : > { %v994_v37 = vpack.c.bf16 %v976_v33, %v974_v29  ;;  %v943_v38 = vadd.f32 %v942_v36, %v3503_v49  ;;  %v977_v41 = vmax.f32 %v941_v35, 0.0 }
 0x157   : > { %v944_v39 = vpop.f32.mrf.mxu0 }
 0x158   : > { %v945_v40 = vadd.f32 %v944_v39, %v3506_v50  ;;  %2689 = vmatprep.mubr.msk.bf16.mxu1 %vm1153_vm2, %v994_v37  ;;  %v978_v48 = vmax.f32 %v943_v38, 0.0  ;;  %v3050_v50 = vld [vmem:[%s3909_s5 + $0x40] sm:$0xff]  }
 0x159   : > { %v946_v47 = vpop.f32.mrf.mxu0  ;;  %1271 = vmatmul.mubr.bf16.gmra.mxu1 %v993_v34 }
 0x15a   : > { %v979_v51 = vmax.f32 %v945_v40, 0.0  ;;  %v947_v52 = vadd.f32 %v946_v47, %v3503_v49  ;;  %1482 = vmatpush2.bf16.msra.mxu1 %v3050_v50  ;;  %v3051_v49 = vld [vmem:[%s3911_s7 + $0x38] sm:$0xff]  }
 0x15b   : > { %2811 = vmatprep.subr.bf16.mxu0 %v3051_v49 }
 0x15c   : > { %v980_v53 = vmax.f32 %v947_v52, 0.0  ;;  %v995_v54 = vpack.c.bf16 %v979_v51, %v977_v41  ;;  %2812 = vmatpush3.bf16.msra.mxu0 %v3051_v49 }
 0x15d   : > { %2813 = vmatprep.subr.bf16.mxu0 %v3052_v57 }
 0x15e   : > { %v996_v55 = vpack.c.bf16 %v980_v53, %v978_v48 }
 0x160   : > { %2690 = vmatprep.mubr.msk.bf16.mxu1 %vm1153_vm2, %v996_v55  ;;  %2814 = vmatpush3.bf16.msra.mxu0 %v3052_v57 }
 0x161   : > { %1281 = vmatmul.mubr.bf16.gmra.mxu1 %v995_v54  ;;  %2815 = vmatprep.subr.bf16.mxu0 %v3053_v42 }
 0x164   : > { %2816 = vmatpush3.bf16.msra.mxu0 %v3053_v42 }
 0x165   : > { %2817 = vmatprep.subr.bf16.mxu0 %v3054_v58 }
 0x168   : > { %2818 = vmatpush3.bf16.msra.mxu0 %v3054_v58 }
 0x169   : > { %2819 = vmatprep.subr.bf16.mxu0 %v3055_v59 }
 0x16c   : > { %2820 = vmatpush3.bf16.msra.mxu0 %v3055_v59 }
 0x1e9   : > { %v1212_v61 = vpop.f32.mrf.mxu1 }
 0x1ea   : > { %v1213_v4 = vadd.f32 %v1212_v61, %v3610_v63 }
 0x1eb   : > { %v1214_v0 = vpop.f32.mrf.mxu1 }
 0x1ec   : > { %v1215_v2 = vadd.f32 %v1214_v0, %v3607_v62  ;;  %v1291_v45 = vmax.f32 %v1213_v4, 0.0 }
 0x1ed   : > { %v1216_v1 = vpop.f32.mrf.mxu1 }
 0x1ee   : > { %v1217_v3 = vadd.f32 %v1216_v1, %v3610_v63  ;;  %v1292_v9 = vmax.f32 %v1215_v2, 0.0 }
 0x1ef   : > { %v1218_v5 = vpop.f32.mrf.mxu1 }
 0x1f0   : > { %v1219_v6 = vadd.f32 %v1218_v5, %v3607_v62  ;;  %v1293_v7 = vmax.f32 %v1217_v3, 0.0 }
 0x1f1   : > { %v1222_v8 = vpop.f32.mrf.mxu1 }
 0x1f2   : > { %v1294_v10 = vmax.f32 %v1219_v6, 0.0  ;;  %v1323_v13 = vpack.c.bf16 %v1293_v7, %v1291_v45  ;;  %v1223_v17 = vadd.f32 %v1222_v8, %v3610_v63 }
 0x1f3   : > { %v1224_v11 = vpop.f32.mrf.mxu1 }
 0x1f4   : > { %v1324_v12 = vpack.c.bf16 %v1294_v10, %v1292_v9  ;;  %v1225_v15 = vadd.f32 %v1224_v11, %v3607_v62  ;;  %v1295_v24 = vmax.f32 %v1223_v17, 0.0 }
 0x1f5   : > { %v1226_v14 = vpop.f32.mrf.mxu1 }
 0x1f6   : > { %v1227_v16 = vadd.f32 %v1226_v14, %v3610_v63  ;;  %2702 = vmatprep.mubr.msk.bf16.mxu1 %vm1426_vm3, %v1324_v12  ;;  %v1296_v22 = vmax.f32 %v1225_v15, 0.0 }
 0x1f7   : > { %v1228_v18 = vpop.f32.mrf.mxu1  ;;  %1484 = vmatmul.mubr.bf16.vlgmr.msra.gmra.mxu1 %v1323_v13 }
 0x1f8   : > { %v1229_v19 = vadd.f32 %v1228_v18, %v3607_v62  ;;  %v1297_v20 = vmax.f32 %v1227_v16, 0.0 }
 0x1f9   : > { %v1232_v21 = vpop.f32.mrf.mxu1 }
 0x1fa   : > { %v1298_v23 = vmax.f32 %v1229_v19, 0.0  ;;  %v1325_v27 = vpack.c.bf16 %v1297_v20, %v1295_v24  ;;  %v1233_v31 = vadd.f32 %v1232_v21, %v3610_v63 }
 0x1fb   : > { %v1234_v25 = vpop.f32.mrf.mxu1 }
 0x1fc   : > { %v1326_v26 = vpack.c.bf16 %v1298_v23, %v1296_v22  ;;  %v1235_v29 = vadd.f32 %v1234_v25, %v3607_v62  ;;  %v1299_v38 = vmax.f32 %v1233_v31, 0.0 }
 0x1fd   : > { %v1236_v28 = vpop.f32.mrf.mxu1 }
 0x1fe   : > { %v1237_v30 = vadd.f32 %v1236_v28, %v3610_v63  ;;  %2703 = vmatprep.mubr.msk.bf16.mxu1 %vm1426_vm3, %v1326_v26  ;;  %v1300_v36 = vmax.f32 %v1235_v29, 0.0 }
 0x1ff   : > { %v1238_v32 = vpop.f32.mrf.mxu1  ;;  %1492 = vmatmul.mubr.bf16.gmra.mxu1 %v1325_v27 }
 0x200   : > { %v1239_v33 = vadd.f32 %v1238_v32, %v3607_v62  ;;  %v1301_v34 = vmax.f32 %v1237_v30, 0.0 }
 0x201   : > { %v1242_v35 = vpop.f32.mrf.mxu1 }
 0x202   : > { %v1302_v37 = vmax.f32 %v1239_v33, 0.0  ;;  %v1327_v41 = vpack.c.bf16 %v1301_v34, %v1299_v38  ;;  %v1243_v52 = vadd.f32 %v1242_v35, %v3610_v63 }
 0x203   : > { %v1244_v39 = vpop.f32.mrf.mxu1 }
 0x204   : > { %v1328_v40 = vpack.c.bf16 %v1302_v37, %v1300_v36  ;;  %v1245_v48 = vadd.f32 %v1244_v39, %v3607_v62  ;;  %v1303_v57 = vmax.f32 %v1243_v52, 0.0 }
 0x205   : > { %v1246_v47 = vpop.f32.mrf.mxu1 }
 0x206   : > { %v1247_v51 = vadd.f32 %v1246_v47, %v3610_v63  ;;  %2704 = vmatprep.mubr.msk.bf16.mxu1 %vm1426_vm3, %v1328_v40  ;;  %v1304_v50 = vmax.f32 %v1245_v48, 0.0 }
 0x207   : > { %v1248_v53 = vpop.f32.mrf.mxu1  ;;  %1500 = vmatmul.mubr.bf16.gmra.mxu1 %v1327_v41 }
 0x208   : > { %v1249_v54 = vadd.f32 %v1248_v53, %v3607_v62  ;;  %v1305_v55 = vmax.f32 %v1247_v51, 0.0 }
 0x209   : > { %v1252_v56 = vpop.f32.mrf.mxu1 }
 0x20a   : > { %v1306_v49 = vmax.f32 %v1249_v54, 0.0  ;;  %v1253_v42 = vadd.f32 %v1252_v56, %v3610_v63  ;;  %v1329_v61 = vpack.c.bf16 %v1305_v55, %v1303_v57  ;;  %v3059_v57 = vld [vmem:[%s3913_s9 + $0x18] sm:$0xff]  }
 0x20b   : > { %v1254_v58 = vpop.f32.mrf.mxu1 }
 0x20c   : > { %v1330_v59 = vpack.c.bf16 %v1306_v49, %v1304_v50  ;;  %v1255_v60 = vadd.f32 %v1254_v58, %v3607_v62  ;;  %v1307_v2 = vmax.f32 %v1253_v42, 0.0  ;;  %v3056_v49 = vld [vmem:[%s3911_s7 + $0x10] sm:$0xff]   ;;  %v3667_v42 = vld [vmem:[%s3910_s6] ss:$0 sm:$0xff] }
 0x20d   : > { %v1256_v0 = vpop.f32.mrf.mxu1  ;;  %2821 = vmatprep.subr.bf16.mxu0 %v3056_v49 }
 0x20e   : > { %v1257_v1 = vadd.f32 %v1256_v0, %v3610_v63  ;;  %2705 = vmatprep.mubr.msk.bf16.mxu1 %vm1426_vm3, %v1330_v59  ;;  %v1308_v4 = vmax.f32 %v1255_v60, 0.0  ;;  %2822 = vmatpush3.bf16.msra.mxu0 %v3056_v49 }
 0x20f   : > { %v1258_v3 = vpop.f32.mrf.mxu1  ;;  %1508 = vmatmul.mubr.bf16.gmra.mxu1 %v1329_v61 }
 0x210   : > { %v1309_v5 = vmax.f32 %v1257_v1, 0.0  ;;  %v1259_v6 = vadd.f32 %v1258_v3, %v3607_v62 }
 0x211   : > { %v1262_v7 = vpop.f32.mrf.mxu1 }
 0x212   : > { %v1310_v8 = vmax.f32 %v1259_v6, 0.0  ;;  %v1331_v9 = vpack.c.bf16 %v1309_v5, %v1307_v2  ;;  %v1263_v10 = vadd.f32 %v1262_v7, %v3610_v63 }
 0x213   : > { %v1264_v45 = vpop.f32.mrf.mxu1 }
 0x214   : > { %v1332_v11 = vpack.c.bf16 %v1310_v8, %v1308_v4  ;;  %v1265_v12 = vadd.f32 %v1264_v45, %v3607_v62  ;;  %v1311_v15 = vmax.f32 %v1263_v10, 0.0 }
 0x215   : > { %v1266_v13 = vpop.f32.mrf.mxu1 }
 0x216   : > { %v1267_v14 = vadd.f32 %v1266_v13, %v3610_v63  ;;  %2706 = vmatprep.mubr.msk.bf16.mxu1 %vm1426_vm3, %v1332_v11  ;;  %v1312_v17 = vmax.f32 %v1265_v12, 0.0 }
 0x217   : > { %v1268_v16 = vpop.f32.mrf.mxu1  ;;  %1516 = vmatmul.mubr.bf16.gmra.mxu1 %v1331_v9 }
 0x218   : > { %v1313_v18 = vmax.f32 %v1267_v14, 0.0  ;;  %v1269_v19 = vadd.f32 %v1268_v16, %v3607_v62  ;;  %v3060_v14 = vld [vmem:[%s3913_s9 + $0x10] sm:$0xff]  }
 0x219   : > { %v1272_v20 = vpop.f32.mrf.mxu1 }
 0x21a   : > { %v1314_v21 = vmax.f32 %v1269_v19, 0.0  ;;  %v1333_v22 = vpack.c.bf16 %v1313_v18, %v1311_v15  ;;  %v1273_v23 = vadd.f32 %v1272_v20, %v3610_v63 }
 0x21b   : > { %v1274_v24 = vpop.f32.mrf.mxu1 }
 0x21c   : > { %v1334_v25 = vpack.c.bf16 %v1314_v21, %v1312_v17  ;;  %v1275_v26 = vadd.f32 %v1274_v24, %v3607_v62  ;;  %v1315_v29 = vmax.f32 %v1273_v23, 0.0 }
 0x21d   : > { %v1276_v27 = vpop.f32.mrf.mxu1 }
 0x21e   : > { %v1277_v28 = vadd.f32 %v1276_v27, %v3610_v63  ;;  %2707 = vmatprep.mubr.msk.bf16.mxu1 %vm1426_vm3, %v1334_v25  ;;  %v1316_v31 = vmax.f32 %v1275_v26, 0.0 }
 0x21f   : > { %v1278_v30 = vpop.f32.mrf.mxu1  ;;  %1524 = vmatmul.mubr.bf16.gmra.mxu1 %v1333_v22 }
 0x220   : > { %v1317_v32 = vmax.f32 %v1277_v28, 0.0  ;;  %v1279_v33 = vadd.f32 %v1278_v30, %v3607_v62 }
 0x221   : > { %v1282_v34 = vpop.f32.mrf.mxu1 }
 0x222   : > { %v1318_v35 = vmax.f32 %v1279_v33, 0.0  ;;  %v1335_v36 = vpack.c.bf16 %v1317_v32, %v1315_v29  ;;  %v1283_v37 = vadd.f32 %v1282_v34, %v3610_v63 }
 0x223   : > { %v1284_v38 = vpop.f32.mrf.mxu1 }
 0x224   : > { %v1336_v39 = vpack.c.bf16 %v1318_v35, %v1316_v31  ;;  %v1285_v40 = vadd.f32 %v1284_v38, %v3607_v62  ;;  %v1319_v48 = vmax.f32 %v1283_v37, 0.0 }
 0x225   : > { %v1286_v41 = vpop.f32.mrf.mxu1 }
 0x226   : > { %v1287_v47 = vadd.f32 %v1286_v41, %v3610_v63  ;;  %2708 = vmatprep.mubr.msk.bf16.mxu1 %vm1426_vm3, %v1336_v39  ;;  %v1320_v52 = vmax.f32 %v1285_v40, 0.0  ;;  %v3057_v63 = vld [vmem:[%s3911_s7 + $0x8] sm:$0xff]  }
 0x227   : > { %v1288_v51 = vpop.f32.mrf.mxu1  ;;  %1532 = vmatmul.mubr.bf16.gmra.mxu1 %v1335_v36  ;;  %2823 = vmatprep.subr.bf16.mxu0 %v3057_v63 }
 0x228   : > { %v1321_v53 = vmax.f32 %v1287_v47, 0.0  ;;  %v1289_v54 = vadd.f32 %v1288_v51, %v3607_v62  ;;  %2824 = vmatpush3.bf16.msra.mxu0 %v3057_v63  ;;  %v3058_v62 = vld [vmem:[%s3911_s7] sm:$0xff]  }
 0x229   : > { %2825 = vmatprep.subr.bf16.mxu0 %v3058_v62 }
 0x22a   : > { %v1322_v55 = vmax.f32 %v1289_v54, 0.0  ;;  %v1337_v56 = vpack.c.bf16 %v1321_v53, %v1319_v48 }
 0x22c   : > { %v1338_v50 = vpack.c.bf16 %v1322_v55, %v1320_v52  ;;  %2826 = vmatpush3.bf16.msra.mxu0 %v3058_v62 }
 0x22d   : > { %2843 = vmatprep.subr.bf16.mxu0 %v3059_v57 }
 0x22e   : > { %2709 = vmatprep.mubr.msk.bf16.mxu1 %vm1426_vm3, %v1338_v50 }
 0x22f   : > { %1540 = vmatmul.mubr.bf16.gmra.mxu1 %v1337_v56 }
 0x2b7   : > { %v1485_v58 = vpop.f32.mrf.mxu1 }
 0x2b8   : > { %v1486_v60 = vadd.f32 %v3667_v42, %v1485_v58 }
 0x2b9   : > { %v1487_v59 = vpop.f32.mrf.mxu1 }
 0x2ba   : > { %v1548_v2 = vmax.f32 %v1486_v60, 0.0 }
 0x2bb   : > { %v1488_v61 = vpop.f32.mrf.mxu1 }
 0x2bc   : > { %v1489_v0 = vadd.f32 %v3667_v42, %v1488_v61 }
 0x2bd   : > { %v1490_v1 = vpop.f32.mrf.mxu1 }
 0x2be   : > { %v1549_v3 = vmax.f32 %v1489_v0, 0.0 }
 0x2bf   : > { %v1493_v4 = vpop.f32.mrf.mxu1 }
 0x2c0   : > { %v1564_v5 = vpack.c.bf16 %v1549_v3, %v1548_v2  ;;  %v1494_v7 = vadd.f32 %v3667_v42, %v1493_v4 }
 0x2c1   : > { %v1495_v6 = vpop.f32.mrf.mxu1 }
 0x2c2   : > { %2827 = vmatprep.mubr.bf16.mxu0 %v1564_v5  ;;  %v1550_v45 = vmax.f32 %v1494_v7, 0.0 }
 0x2c3   : > { %v1496_v8 = vpop.f32.mrf.mxu1 }
 0x2c4   : > { %v1497_v9 = vadd.f32 %v3667_v42, %v1496_v8 }
 0x2c5   : > { %v1498_v10 = vpop.f32.mrf.mxu1 }
 0x2c6   : > { %v1551_v11 = vmax.f32 %v1497_v9, 0.0  ;;  %v3061_v9 = vld [vmem:[%s3913_s9 + $0x8] sm:$0xff]   ;;  %v3062_v10 = vld [vmem:[%s3913_s9] sm:$0xff]  }
 0x2c7   : > { %v1501_v12 = vpop.f32.mrf.mxu1 }
 0x2c8   : > { %v1565_v13 = vpack.c.bf16 %v1551_v11, %v1550_v45  ;;  %v1502_v16 = vadd.f32 %v3667_v42, %v1501_v12  ;;  %v3064_v45 = vld [vmem:[%s3915_s11 + $0x10] sm:$0xff]   ;;  %v3065_v11 = vld [vmem:[%s3915_s11 + $0x8] sm:$0xff]  }
 0x2c9   : > { %v1503_v15 = vpop.f32.mrf.mxu1 }
 0x2ca   : > { %2828 = vmatmul.mubr.bf16.vlgmr.msra.gmra.mxu0 %v1565_v13  ;;  %v1552_v20 = vmax.f32 %v1502_v16, 0.0 }
 0x2cb   : > { %v1504_v17 = vpop.f32.mrf.mxu1  ;;  %2844 = vmatpush3.bf16.msra.mxu0 %v3059_v57 }
 0x2cc   : > { %v1505_v18 = vadd.f32 %v3667_v42, %v1504_v17  ;;  %2845 = vmatprep.subr.bf16.mxu0 %v3060_v14 }
 0x2cd   : > { %v1506_v19 = vpop.f32.mrf.mxu1 }
 0x2ce   : > { %v1553_v21 = vmax.f32 %v1505_v18, 0.0 }
 0x2cf   : > { %v1509_v22 = vpop.f32.mrf.mxu1  ;;  %2846 = vmatpush3.bf16.msra.mxu0 %v3060_v14  ;;  %v2710_v14 = vld [vmem:[%s3912_s8] ss:$0 sm:$0xff] }
 0x2d0   : > { %v1566_v23 = vpack.c.bf16 %v1553_v21, %v1552_v20  ;;  %v1510_v25 = vadd.f32 %v3667_v42, %v1509_v22  ;;  %2847 = vmatprep.subr.bf16.mxu0 %v3061_v9 }
 0x2d1   : > { %v1511_v24 = vpop.f32.mrf.mxu1 }
 0x2d2   : > { %2831 = vmatprep.mubr.bf16.mxu0 %v1566_v23  ;;  %v1554_v29 = vmax.f32 %v1510_v25, 0.0 }
 0x2d3   : > { %v1512_v26 = vpop.f32.mrf.mxu1  ;;  %2848 = vmatpush3.bf16.msra.mxu0 %v3061_v9 }
 0x2d4   : > { %v1513_v27 = vadd.f32 %v3667_v42, %v1512_v26  ;;  %2849 = vmatprep.subr.bf16.mxu0 %v3062_v10 }
 0x2d5   : > { %v1514_v28 = vpop.f32.mrf.mxu1 }
 0x2d6   : > { %v1555_v30 = vmax.f32 %v1513_v27, 0.0 }
 0x2d7   : > { %v1517_v31 = vpop.f32.mrf.mxu1  ;;  %2850 = vmatpush3.bf16.msra.mxu0 %v3062_v10  ;;  %v3066_v10 = vld [vmem:[%s3915_s11] sm:$0xff]  }
 0x2d8   : > { %v1567_v32 = vpack.c.bf16 %v1555_v30, %v1554_v29  ;;  %v1518_v34 = vadd.f32 %v3667_v42, %v1517_v31 }
 0x2d9   : > { %v1519_v33 = vpop.f32.mrf.mxu1 }
 0x2da   : > { %2832 = vmatmul.mubr.bf16.gmra.mxu0 %v1567_v32  ;;  %v1556_v38 = vmax.f32 %v1518_v34, 0.0 }
 0x2db   : > { %v1520_v35 = vpop.f32.mrf.mxu1 }
 0x2dc   : > { %v1521_v36 = vadd.f32 %v3667_v42, %v1520_v35 }
 0x2dd   : > { %v1522_v37 = vpop.f32.mrf.mxu1 }
 0x2de   : > { %v1557_v39 = vmax.f32 %v1521_v36, 0.0 }
 0x2df   : > { %v1525_v40 = vpop.f32.mrf.mxu1 }
 0x2e0   : > { %v1568_v41 = vpack.c.bf16 %v1557_v39, %v1556_v38  ;;  %v1526_v48 = vadd.f32 %v3667_v42, %v1525_v40 }
 0x2e1   : > { %v1527_v47 = vpop.f32.mrf.mxu1 }
 0x2e2   : > { %2835 = vmatprep.mubr.bf16.mxu0 %v1568_v41  ;;  %v1558_v54 = vmax.f32 %v1526_v48, 0.0 }
 0x2e3   : > { %v1528_v51 = vpop.f32.mrf.mxu1 }
 0x2e4   : > { %v1529_v52 = vadd.f32 %v3667_v42, %v1528_v51 }
 0x2e5   : > { %v1530_v53 = vpop.f32.mrf.mxu1 }
 0x2e6   : > { %v1559_v55 = vmax.f32 %v1529_v52, 0.0 }
 0x2e7   : > { %v1533_v56 = vpop.f32.mrf.mxu1 }
 0x2e8   : > { %v1569_v50 = vpack.c.bf16 %v1559_v55, %v1558_v54  ;;  %v1534_v63 = vadd.f32 %v3667_v42, %v1533_v56 }
 0x2e9   : > { %v1535_v49 = vpop.f32.mrf.mxu1 }
 0x2ea   : > { %2836 = vmatmul.mubr.bf16.gmra.mxu0 %v1569_v50  ;;  %v1560_v59 = vmax.f32 %v1534_v63, 0.0 }
 0x2eb   : > { %v1536_v62 = vpop.f32.mrf.mxu1 }
 0x2ec   : > { %v1537_v57 = vadd.f32 %v3667_v42, %v1536_v62 }
 0x2ed   : > { %v1538_v58 = vpop.f32.mrf.mxu1 }
 0x2ee   : > { %v1561_v60 = vmax.f32 %v1537_v57, 0.0 }
 0x2ef   : > { %v1541_v61 = vpop.f32.mrf.mxu1 }
 0x2f0   : > { %v1570_v0 = vpack.c.bf16 %v1561_v60, %v1560_v59  ;;  %v1542_v2 = vadd.f32 %v3667_v42, %v1541_v61 }
 0x2f1   : > { %v1543_v1 = vpop.f32.mrf.mxu1 }
 0x2f2   : > { %2839 = vmatprep.mubr.bf16.mxu0 %v1570_v0  ;;  %v1562_v6 = vmax.f32 %v1542_v2, 0.0 }
 0x2f3   : > { %v1544_v3 = vpop.f32.mrf.mxu1 }
 0x2f4   : > { %v1545_v4 = vadd.f32 %v3667_v42, %v1544_v3  ;;  %v3063_v42 = vld [vmem:[%s3915_s11 + $0x18] sm:$0xff]  }
 0x2f5   : > { %v1546_v5 = vpop.f32.mrf.mxu1  ;;  %2867 = vmatprep.subr.bf16.mxu1 %v3063_v42 }
 0x2f6   : > { %v1563_v7 = vmax.f32 %v1545_v4, 0.0  ;;  %2868 = vmatpush3.bf16.msra.mxu1 %v3063_v42  ;;  %v3067_v42 = vld [vmem:[%s3917_s13 + $0x8] sm:$0xff]  }
 0x2f7   : > { %2869 = vmatprep.subr.bf16.mxu1 %v3064_v45  ;;  %2891 = vmatprep.subr.bf16.mxu0 %v3067_v42 }
 0x2f8   : > { %v1571_v8 = vpack.c.bf16 %v1563_v7, %v1562_v6 }
 0x2fa   : > { %2840 = vmatmul.mubr.bf16.gmra.mxu0 %v1571_v8  ;;  %2870 = vmatpush3.bf16.msra.mxu1 %v3064_v45 }
 0x2fb   : > { %2871 = vmatprep.subr.bf16.mxu1 %v3065_v11 }
 0x2fe   : > { %2872 = vmatpush3.bf16.msra.mxu1 %v3065_v11 }
 0x2ff   : > { %2873 = vmatprep.subr.bf16.mxu1 %v3066_v10 }
 0x302   : > { %2874 = vmatpush3.bf16.msra.mxu1 %v3066_v10 }
 0x303   : > { %2911 = vmatprep.subr.bf16.mxu1 %v3067_v42 }
 0x38a   : > { %v2829_v12 = vpop.f32.mrf.mxu0 }
 0x38b   : > { %v1686_v18 = vadd.f32 %v2829_v12, %v2710_v14  ;;  %v2719_v12 = vld [vmem:[%s3914_s10] ss:$0 sm:$0xff] }
 0x38c   : > { %v1677_v13 = vpop.f32.mrf.mxu0 }
 0x38d   : > { %v1678_v16 = vadd.f32 %v2710_v14, %v1677_v13  ;;  %v1742_v24 = vmax.f32 %v1686_v18, 0.0 }
 0x38e   : > { %v2830_v15 = vpop.f32.mrf.mxu0 }
 0x38f   : > { %v1689_v17 = vadd.f32 %v2830_v15, %v2710_v14  ;;  %v1740_v22 = vmax.f32 %v1678_v16, 0.0 }
 0x390   : > { %v1680_v19 = vpop.f32.mrf.mxu0 }
 0x391   : > { %v1681_v20 = vadd.f32 %v2710_v14, %v1680_v19  ;;  %v1743_v21 = vmax.f32 %v1689_v17, 0.0 }
 0x393   : > { %v1741_v23 = vmax.f32 %v1681_v20, 0.0  ;;  %v1757_v26 = vpack.c.bf16 %v1743_v21, %v1742_v24 }
 0x395   : > { %v1756_v25 = vpack.c.bf16 %v1741_v23, %v1740_v22 }
 0x397   : > { %2851 = vmatprep.mubr.msk.bf16.mxu0 %vm1153_vm2, %v1756_v25 }
 0x398   : > { %2852 = vmatmul.mubr.msk.bf16.vlgmr.msra.gmra.mxu0 %vm1153_vm2, %v1757_v26 }
 0x399   : > { %2892 = vmatpush3.bf16.msra.mxu0 %v3067_v42 }
 0x39a   : > { %v2833_v27 = vpop.f32.mrf.mxu0 }
 0x39b   : > { %v1702_v32 = vadd.f32 %v2833_v27, %v2710_v14 }
 0x39c   : > { %v1693_v28 = vpop.f32.mrf.mxu0 }
 0x39d   : > { %v1694_v30 = vadd.f32 %v2710_v14, %v1693_v28  ;;  %v1746_v38 = vmax.f32 %v1702_v32, 0.0 }
 0x39e   : > { %v2834_v29 = vpop.f32.mrf.mxu0 }
 0x39f   : > { %v1705_v31 = vadd.f32 %v2834_v29, %v2710_v14  ;;  %v1744_v36 = vmax.f32 %v1694_v30, 0.0 }
 0x3a0   : > { %v1696_v33 = vpop.f32.mrf.mxu0 }
 0x3a1   : > { %v1697_v34 = vadd.f32 %v2710_v14, %v1696_v33  ;;  %v1747_v35 = vmax.f32 %v1705_v31, 0.0 }
 0x3a3   : > { %v1745_v37 = vmax.f32 %v1697_v34, 0.0  ;;  %v1759_v40 = vpack.c.bf16 %v1747_v35, %v1746_v38 }
 0x3a5   : > { %v1758_v39 = vpack.c.bf16 %v1745_v37, %v1744_v36 }
 0x3a7   : > { %2855 = vmatprep.mubr.msk.bf16.mxu0 %vm1153_vm2, %v1758_v39 }
 0x3a8   : > { %2856 = vmatmul.mubr.msk.bf16.gmra.mxu0 %vm1153_vm2, %v1759_v40 }
 0x3aa   : > { %v2837_v41 = vpop.f32.mrf.mxu0 }
 0x3ab   : > { %v1718_v53 = vadd.f32 %v2837_v41, %v2710_v14 }
 0x3ac   : > { %v1709_v47 = vpop.f32.mrf.mxu0 }
 0x3ad   : > { %v1710_v51 = vadd.f32 %v2710_v14, %v1709_v47  ;;  %v1750_v63 = vmax.f32 %v1718_v53, 0.0 }
 0x3ae   : > { %v2838_v48 = vpop.f32.mrf.mxu0 }
 0x3af   : > { %v1721_v52 = vadd.f32 %v2838_v48, %v2710_v14  ;;  %v1748_v50 = vmax.f32 %v1710_v51, 0.0 }
 0x3b0   : > { %v1712_v54 = vpop.f32.mrf.mxu0 }
 0x3b1   : > { %v1713_v55 = vadd.f32 %v2710_v14, %v1712_v54  ;;  %v1751_v56 = vmax.f32 %v1721_v52, 0.0 }
 0x3b3   : > { %v1749_v49 = vmax.f32 %v1713_v55, 0.0  ;;  %v1761_v57 = vpack.c.bf16 %v1751_v56, %v1750_v63 }
 0x3b5   : > { %v1760_v62 = vpack.c.bf16 %v1749_v49, %v1748_v50 }
 0x3b7   : > { %2859 = vmatprep.mubr.msk.bf16.mxu0 %vm1153_vm2, %v1760_v62 }
 0x3b8   : > { %2860 = vmatmul.mubr.msk.bf16.gmra.mxu0 %vm1153_vm2, %v1761_v57 }
 0x3ba   : > { %v2841_v58 = vpop.f32.mrf.mxu0 }
 0x3bb   : > { %v1734_v1 = vadd.f32 %v2841_v58, %v2710_v14 }
 0x3bc   : > { %v1725_v59 = vpop.f32.mrf.mxu0 }
 0x3bd   : > { %v1726_v61 = vadd.f32 %v2710_v14, %v1725_v59  ;;  %v1754_v7 = vmax.f32 %v1734_v1, 0.0 }
 0x3be   : > { %v2842_v60 = vpop.f32.mrf.mxu0 }
 0x3bf   : > { %v1737_v0 = vadd.f32 %v2842_v60, %v2710_v14  ;;  %v1752_v5 = vmax.f32 %v1726_v61, 0.0 }
 0x3c0   : > { %v1728_v2 = vpop.f32.mrf.mxu0 }
 0x3c1   : > { %v1729_v3 = vadd.f32 %v2710_v14, %v1728_v2  ;;  %v1755_v4 = vmax.f32 %v1737_v0, 0.0 }
 0x3c3   : > { %v1753_v6 = vmax.f32 %v1729_v3, 0.0  ;;  %v1763_v9 = vpack.c.bf16 %v1755_v4, %v1754_v7 }
 0x3c5   : > { %v1762_v8 = vpack.c.bf16 %v1753_v6, %v1752_v5 }
 0x3c7   : > { %2863 = vmatprep.mubr.msk.bf16.mxu0 %vm1153_vm2, %v1762_v8  ;;  %v3068_v8 = vld [vmem:[%s3917_s13] sm:$0xff]  }
 0x3c8   : > { %2864 = vmatmul.mubr.msk.bf16.gmra.mxu0 %vm1153_vm2, %v1763_v9  ;;  %2893 = vmatprep.subr.bf16.mxu0 %v3068_v8 }
 0x3c9   : > { %2894 = vmatpush3.bf16.msra.mxu0 %v3068_v8 }
 0x458   : > { %v2853_v45 = vpop.f32.mrf.mxu0 }
 0x459   : > { %v1870_v16 = vadd.f32 %v2853_v45, %v2719_v12 }
 0x45a   : > { %v1861_v11 = vpop.f32.mrf.mxu0 }
 0x45b   : > { %v1862_v14 = vadd.f32 %v2719_v12, %v1861_v11  ;;  %v1926_v22 = vmax.f32 %v1870_v16, 0.0 }
 0x45c   : > { %v2854_v13 = vpop.f32.mrf.mxu0 }
 0x45d   : > { %v1873_v15 = vadd.f32 %v2854_v13, %v2719_v12  ;;  %v1924_v20 = vmax.f32 %v1862_v14, 0.0 }
 0x45e   : > { %v1864_v17 = vpop.f32.mrf.mxu0 }
 0x45f   : > { %v1865_v18 = vadd.f32 %v2719_v12, %v1864_v17  ;;  %v1927_v19 = vmax.f32 %v1873_v15, 0.0 }
 0x461   : > { %v1925_v21 = vmax.f32 %v1865_v18, 0.0  ;;  %v1941_v24 = vpack.c.bf16 %v1927_v19, %v1926_v22 }
 0x463   : > { %v1940_v23 = vpack.c.bf16 %v1925_v21, %v1924_v20 }
 0x465   : > { %2875 = vmatprep.mubr.msk.bf16.mxu1 %vm1153_vm2, %v1940_v23 }
 0x466   : > { %2876 = vmatmul.mubr.msk.bf16.vlgmr.msra.gmra.mxu1 %vm1153_vm2, %v1941_v24 }
 0x467   : > { %2913 = vmatpush3.bf16.msra.mxu1 %v3067_v42  ;;  %v2732_v42 = vld [vmem:[%s3916_s12] ss:$0 sm:$0xff] }
 0x468   : > { %v2857_v25 = vpop.f32.mrf.mxu0  ;;  %2912 = vmatprep.subr.bf16.mxu1 %v3068_v8 }
 0x469   : > { %v1886_v30 = vadd.f32 %v2857_v25, %v2719_v12 }
 0x46a   : > { %v1877_v26 = vpop.f32.mrf.mxu0 }
 0x46b   : > { %v1878_v28 = vadd.f32 %v2719_v12, %v1877_v26  ;;  %v1930_v36 = vmax.f32 %v1886_v30, 0.0  ;;  %2914 = vmatpush3.bf16.msra.mxu1 %v3068_v8 }
 0x46c   : > { %v2858_v27 = vpop.f32.mrf.mxu0 }
 0x46d   : > { %v1889_v29 = vadd.f32 %v2858_v27, %v2719_v12  ;;  %v1928_v34 = vmax.f32 %v1878_v28, 0.0 }
 0x46e   : > { %v1880_v31 = vpop.f32.mrf.mxu0 }
 0x46f   : > { %v1881_v32 = vadd.f32 %v2719_v12, %v1880_v31  ;;  %v1931_v33 = vmax.f32 %v1889_v29, 0.0 }
 0x471   : > { %v1929_v35 = vmax.f32 %v1881_v32, 0.0  ;;  %v1943_v38 = vpack.c.bf16 %v1931_v33, %v1930_v36 }
 0x473   : > { %v1942_v37 = vpack.c.bf16 %v1929_v35, %v1928_v34 }
 0x475   : > { %2879 = vmatprep.mubr.msk.bf16.mxu1 %vm1153_vm2, %v1942_v37 }
 0x476   : > { %2880 = vmatmul.mubr.msk.bf16.gmra.mxu1 %vm1153_vm2, %v1943_v38 }
 0x478   : > { %v2861_v39 = vpop.f32.mrf.mxu0 }
 0x479   : > { %v1902_v51 = vadd.f32 %v2861_v39, %v2719_v12 }
 0x47a   : > { %v1893_v40 = vpop.f32.mrf.mxu0 }
 0x47b   : > { %v1894_v47 = vadd.f32 %v2719_v12, %v1893_v40  ;;  %v1934_v50 = vmax.f32 %v1902_v51, 0.0 }
 0x47c   : > { %v2862_v41 = vpop.f32.mrf.mxu0 }
 0x47d   : > { %v1905_v48 = vadd.f32 %v2862_v41, %v2719_v12  ;;  %v1932_v55 = vmax.f32 %v1894_v47, 0.0 }
 0x47e   : > { %v1896_v52 = vpop.f32.mrf.mxu0 }
 0x47f   : > { %v1897_v53 = vadd.f32 %v2719_v12, %v1896_v52  ;;  %v1935_v54 = vmax.f32 %v1905_v48, 0.0 }
 0x481   : > { %v1933_v56 = vmax.f32 %v1897_v53, 0.0  ;;  %v1945_v63 = vpack.c.bf16 %v1935_v54, %v1934_v50 }
 0x483   : > { %v1944_v49 = vpack.c.bf16 %v1933_v56, %v1932_v55 }
 0x485   : > { %2883 = vmatprep.mubr.msk.bf16.mxu1 %vm1153_vm2, %v1944_v49 }
 0x486   : > { %2884 = vmatmul.mubr.msk.bf16.gmra.mxu1 %vm1153_vm2, %v1945_v63 }
 0x488   : > { %v2865_v62 = vpop.f32.mrf.mxu0 }
 0x489   : > { %v1918_v61 = vadd.f32 %v2865_v62, %v2719_v12 }
 0x48a   : > { %v1909_v57 = vpop.f32.mrf.mxu0 }
 0x48b   : > { %v1910_v59 = vadd.f32 %v2719_v12, %v1909_v57  ;;  %v1938_v5 = vmax.f32 %v1918_v61, 0.0 }
 0x48c   : > { %v2866_v58 = vpop.f32.mrf.mxu0 }
 0x48d   : > { %v1921_v60 = vadd.f32 %v2866_v58, %v2719_v12  ;;  %v1936_v3 = vmax.f32 %v1910_v59, 0.0 }
 0x48e   : > { %v1912_v0 = vpop.f32.mrf.mxu0 }
 0x48f   : > { %v1913_v1 = vadd.f32 %v2719_v12, %v1912_v0  ;;  %v1939_v2 = vmax.f32 %v1921_v60, 0.0 }
 0x491   : > { %v1937_v4 = vmax.f32 %v1913_v1, 0.0  ;;  %v1947_v7 = vpack.c.bf16 %v1939_v2, %v1938_v5 }
 0x493   : > { %v1946_v6 = vpack.c.bf16 %v1937_v4, %v1936_v3 }
 0x495   : > { %2887 = vmatprep.mubr.msk.bf16.mxu1 %vm1153_vm2, %v1946_v6  ;;  %v3748_v6 = vld [vmem:[%s3918_s14] ss:$0 sm:$0xff] }
 0x496   : > { %2888 = vmatmul.mubr.msk.bf16.gmra.mxu1 %vm1153_vm2, %v1947_v7  ;;  %vm2532_vm2 = vcmask 982912  }
 0x526   : > { %v2877_v9 = vpop.f32.mrf.mxu1 }
 0x527   : > { %v2054_v13 = vadd.f32 %v2877_v9, %v2732_v42 }
 0x528   : > { %v2045_v10 = vpop.f32.mrf.mxu1 }
 0x529   : > { %v2046_v11 = vadd.f32 %v2732_v42, %v2045_v10  ;;  %v2110_v19 = vmax.f32 %v2054_v13, 0.0 }
 0x52a   : > { %v2878_v45 = vpop.f32.mrf.mxu1 }
 0x52b   : > { %v2057_v12 = vadd.f32 %v2878_v45, %v2732_v42  ;;  %v2108_v17 = vmax.f32 %v2046_v11, 0.0 }
 0x52c   : > { %v2048_v14 = vpop.f32.mrf.mxu1 }
 0x52d   : > { %v2049_v15 = vadd.f32 %v2732_v42, %v2048_v14  ;;  %v2111_v16 = vmax.f32 %v2057_v12, 0.0 }
 0x52f   : > { %v2109_v18 = vmax.f32 %v2049_v15, 0.0  ;;  %v2125_v21 = vpack.c.bf16 %v2111_v16, %v2110_v19 }
 0x531   : > { %v2124_v20 = vpack.c.bf16 %v2109_v18, %v2108_v17  ;;  %v3757_v17 = vld [vmem:[%s3919_s15] ss:$0 sm:$0xff] }
 0x533   : > { %2895 = vmatprep.mubr.msk.bf16.mxu0 %vm1426_vm3, %v2124_v20 }
 0x534   : > { %2896 = vmatmul.mubr.msk.bf16.vlgmr.msra.gmra.mxu0 %vm1426_vm3, %v2125_v21 }
 0x536   : > { %v2881_v22 = vpop.f32.mrf.mxu1 }
 0x537   : > { %v2070_v27 = vadd.f32 %v2881_v22, %v2732_v42 }
 0x538   : > { %v2061_v23 = vpop.f32.mrf.mxu1 }
 0x539   : > { %v2062_v25 = vadd.f32 %v2732_v42, %v2061_v23  ;;  %v2114_v33 = vmax.f32 %v2070_v27, 0.0 }
 0x53a   : > { %v2882_v24 = vpop.f32.mrf.mxu1 }
 0x53b   : > { %v2073_v26 = vadd.f32 %v2882_v24, %v2732_v42  ;;  %v2112_v31 = vmax.f32 %v2062_v25, 0.0 }
 0x53c   : > { %v2064_v28 = vpop.f32.mrf.mxu1 }
 0x53d   : > { %v2065_v29 = vadd.f32 %v2732_v42, %v2064_v28  ;;  %v2115_v30 = vmax.f32 %v2073_v26, 0.0 }
 0x53f   : > { %v2113_v32 = vmax.f32 %v2065_v29, 0.0  ;;  %v2127_v35 = vpack.c.bf16 %v2115_v30, %v2114_v33 }
 0x541   : > { %v2126_v34 = vpack.c.bf16 %v2113_v32, %v2112_v31 }
 0x543   : > { %2899 = vmatprep.mubr.msk.bf16.mxu0 %vm1426_vm3, %v2126_v34 }
 0x544   : > { %2900 = vmatmul.mubr.msk.bf16.gmra.mxu0 %vm1426_vm3, %v2127_v35 }
 0x546   : > { %v2885_v36 = vpop.f32.mrf.mxu1 }
 0x547   : > { %v2086_v41 = vadd.f32 %v2885_v36, %v2732_v42 }
 0x548   : > { %v2077_v37 = vpop.f32.mrf.mxu1 }
 0x549   : > { %v2078_v39 = vadd.f32 %v2732_v42, %v2077_v37  ;;  %v2118_v54 = vmax.f32 %v2086_v41, 0.0 }
 0x54a   : > { %v2886_v38 = vpop.f32.mrf.mxu1 }
 0x54b   : > { %v2089_v40 = vadd.f32 %v2886_v38, %v2732_v42  ;;  %v2116_v52 = vmax.f32 %v2078_v39, 0.0 }
 0x54c   : > { %v2080_v47 = vpop.f32.mrf.mxu1 }
 0x54d   : > { %v2081_v48 = vadd.f32 %v2732_v42, %v2080_v47  ;;  %v2119_v51 = vmax.f32 %v2089_v40, 0.0 }
 0x54f   : > { %v2117_v53 = vmax.f32 %v2081_v48, 0.0  ;;  %v2129_v56 = vpack.c.bf16 %v2119_v51, %v2118_v54 }
 0x551   : > { %v2128_v55 = vpack.c.bf16 %v2117_v53, %v2116_v52 }
 0x553   : > { %2903 = vmatprep.mubr.msk.bf16.mxu0 %vm1426_vm3, %v2128_v55 }
 0x554   : > { %2904 = vmatmul.mubr.msk.bf16.gmra.mxu0 %vm1426_vm3, %v2129_v56 }
 0x556   : > { %v2889_v50 = vpop.f32.mrf.mxu1 }
 0x557   : > { %v2102_v58 = vadd.f32 %v2889_v50, %v2732_v42 }
 0x558   : > { %v2093_v49 = vpop.f32.mrf.mxu1 }
 0x559   : > { %v2094_v62 = vadd.f32 %v2732_v42, %v2093_v49  ;;  %v2122_v2 = vmax.f32 %v2102_v58, 0.0 }
 0x55a   : > { %v2890_v63 = vpop.f32.mrf.mxu1 }
 0x55b   : > { %v2105_v57 = vadd.f32 %v2890_v63, %v2732_v42  ;;  %v2120_v0 = vmax.f32 %v2094_v62, 0.0 }
 0x55c   : > { %v2096_v59 = vpop.f32.mrf.mxu1 }
 0x55d   : > { %v2097_v60 = vadd.f32 %v2732_v42, %v2096_v59  ;;  %v2123_v61 = vmax.f32 %v2105_v57, 0.0 }
 0x55f   : > { %v2121_v1 = vmax.f32 %v2097_v60, 0.0  ;;  %v2131_v4 = vpack.c.bf16 %v2123_v61, %v2122_v2 }
 0x561   : > { %v2130_v3 = vpack.c.bf16 %v2121_v1, %v2120_v0 }
 0x563   : > { %2907 = vmatprep.mubr.msk.bf16.mxu1 %vm1426_vm3, %v2130_v3 }
 0x564   : > { %2908 = vmatmul.mubr.msk.bf16.vlgmr.msra.gmra.mxu1 %vm1426_vm3, %v2131_v4  ;;  %vm2539_vm3 = vcmask 1048512  }
 0x5f4   : > { %v2897_v5 = vpop.f32.mrf.mxu0 }
 0x5f5   : > { %v2222_v8 = vadd.f32 %v2897_v5, %v3748_v6 }
 0x5f6   : > { %v2213_v7 = vpop.f32.mrf.mxu0 }
 0x5f7   : > { %v2214_v10 = vadd.f32 %v3748_v6, %v2213_v7  ;;  %v2278_v11 = vmax.f32 %v2222_v8, 0.0 }
 0x5f8   : > { %v2898_v9 = vpop.f32.mrf.mxu0 }
 0x5f9   : > { %v2225_v42 = vadd.f32 %v2898_v9, %v3748_v6  ;;  %v2276_v14 = vmax.f32 %v2214_v10, 0.0 }
 0x5fa   : > { %v2216_v45 = vpop.f32.mrf.mxu0 }
 0x5fb   : > { %v2279_v12 = vmax.f32 %v2225_v42, 0.0  ;;  %v2217_v13 = vadd.f32 %v3748_v6, %v2216_v45 }
 0x5fd   : > { %v2293_v15 = vpack.c.bf16 %v2279_v12, %v2278_v11  ;;  %v2277_v16 = vmax.f32 %v2217_v13, 0.0 }
 0x5ff   : > { %v2292_v18 = vpack.c.bf16 %v2277_v16, %v2276_v14  ;;  %v2303_v19 = vunpack.c.l.bf16 %v2293_v15  ;;  %v2304_v20 = vunpack.c.h.bf16 %v2293_v15 }
 0x601   : > { %v2325_v21 = vmul.f32 %v3757_v17, %v2303_v19  ;;  %v2301_v22 = vunpack.c.l.bf16 %v2292_v18  ;;  %v2302_v23 = vunpack.c.h.bf16 %v2292_v18  ;;  %v2326_v26 = vmul.f32 %v3757_v17, %v2304_v20 }
 0x603   : > { %v2346_v24 = vsel %vm2339_vm4, %v2325_v21, 0.0  ;;  %v2323_v25 = vmul.f32 %v3757_v17, %v2301_v22  ;;  %v2324_v29 = vmul.f32 %v3757_v17, %v2302_v23  ;;  %v2349_v32 = vsel %vm2339_vm4, %v2326_v26, 0.0  ;;  %v2388_v22 = vld [vmem:[#allocation2] sm:$0x1] }
 0x604   : > { %2347 = vadd.xlane.f32.xlu1 %v2346_v24  ;;  %v2901_v27 = vpop.f32.mrf.mxu0 }
 0x605   : > { %v2340_v28 = vsel %vm2339_vm4, %v2323_v25, 0.0  ;;  %v2238_v31 = vadd.f32 %v2901_v27, %v3748_v6  ;;  %v2343_v36 = vsel %vm2339_vm4, %v2324_v29, 0.0 }
 0x606   : > { %v2229_v30 = vpop.f32.mrf.mxu0  ;;  %2341 = vadd.xlane.f32.xlu0 %v2340_v28 }
 0x607   : > { %v2230_v34 = vadd.f32 %v3748_v6, %v2229_v30  ;;  %v2282_v38 = vmax.f32 %v2238_v31, 0.0 }
 0x608   : > { %2350 = vadd.xlane.f32.xlu1 %v2349_v32  ;;  %v2902_v33 = vpop.f32.mrf.mxu0 }
 0x609   : > { %v2241_v35 = vadd.f32 %v2902_v33, %v3748_v6  ;;  %v2280_v41 = vmax.f32 %v2230_v34, 0.0 }
 0x60a   : > { %v2232_v37 = vpop.f32.mrf.mxu0  ;;  %2344 = vadd.xlane.f32.xlu0 %v2343_v36 }
 0x60b   : > { %v2283_v39 = vmax.f32 %v2241_v35, 0.0  ;;  %v2233_v40 = vadd.f32 %v3748_v6, %v2232_v37 }
 0x60d   : > { %v2295_v47 = vpack.c.bf16 %v2283_v39, %v2282_v38  ;;  %v2281_v48 = vmax.f32 %v2233_v40, 0.0 }
 0x60f   : > { %v2294_v51 = vpack.c.bf16 %v2281_v48, %v2280_v41  ;;  %v2307_v52 = vunpack.c.l.bf16 %v2295_v47  ;;  %v2308_v63 = vunpack.c.h.bf16 %v2295_v47 }
 0x611   : > { %v2329_v53 = vmul.f32 %v3757_v17, %v2307_v52  ;;  %v2306_v54 = vunpack.c.h.bf16 %v2294_v51  ;;  %v2305_v55 = vunpack.c.l.bf16 %v2294_v51  ;;  %v2330_v61 = vmul.f32 %v3757_v17, %v2308_v63 }
 0x613   : > { %v2358_v56 = vsel %vm2339_vm4, %v2329_v53, 0.0  ;;  %v2328_v50 = vmul.f32 %v3757_v17, %v2306_v54  ;;  %v2327_v49 = vmul.f32 %v3757_v17, %v2305_v55  ;;  %v2361_v8 = vsel %vm2339_vm4, %v2330_v61, 0.0 }
 0x614   : > { %v2905_v62 = vpop.f32.mrf.mxu0  ;;  %2359 = vadd.xlane.f32.xlu0 %v2358_v56  ;;  %v3804_v61 = vand.u32 127, %v636_v43 }
 0x615   : > { %v2355_v57 = vsel %vm2339_vm4, %v2328_v50, 0.0  ;;  %v2254_v59 = vadd.f32 %v2905_v62, %v3748_v6  ;;  %v2352_v60 = vsel %vm2339_vm4, %v2327_v49, 0.0 }
 0x616   : > { %v2245_v58 = vpop.f32.mrf.mxu0  ;;  %2356 = vadd.xlane.f32.xlu1 %v2355_v57 }
 0x617   : > { %v2246_v1 = vadd.f32 %v3748_v6, %v2245_v58  ;;  %v2286_v4 = vmax.f32 %v2254_v59, 0.0 }
 0x618   : > { %v2906_v0 = vpop.f32.mrf.mxu0  ;;  %2353 = vadd.xlane.f32.xlu0 %v2352_v60 }
 0x619   : > { %v2257_v2 = vadd.f32 %v2906_v0, %v3748_v6  ;;  %v2284_v9 = vmax.f32 %v2246_v1, 0.0 }
 0x61a   : > { %v2248_v3 = vpop.f32.mrf.mxu0 }
 0x61b   : > { %v2287_v5 = vmax.f32 %v2257_v2, 0.0  ;;  %v2249_v7 = vadd.f32 %v3748_v6, %v2248_v3  ;;  %v2436_v2 = vadd.s32 4294967288, %v3804_v61  ;;  %v2443_v3 = vadd.s32 4294967280, %v3804_v61 }
 0x61c   : > { %2362 = vadd.xlane.f32.xlu0 %v2361_v8  ;;  %v2434_v8 = vsub.s32 %v3804_v61, %v3492_v44 }
 0x61d   : > { %v2297_v10 = vpack.c.bf16 %v2287_v5, %v2286_v4  ;;  %v2285_v42 = vmax.f32 %v2249_v7, 0.0  ;;  %v2439_v43 = vsub.s32 %v2436_v2, %v3492_v44 }
 0x61f   : > { %v2296_v45 = vpack.c.bf16 %v2285_v42, %v2284_v9  ;;  %v2311_v11 = vunpack.c.l.bf16 %v2297_v10  ;;  %v2312_v12 = vunpack.c.h.bf16 %v2297_v10  ;;  %v2446_v10 = vsub.s32 %v2443_v3, %v3492_v44 }
 0x621   : > { %v2333_v13 = vmul.f32 %v3757_v17, %v2311_v11  ;;  %v2309_v14 = vunpack.c.l.bf16 %v2296_v45  ;;  %v2334_v15 = vmul.f32 %v3757_v17, %v2312_v12  ;;  %v2310_v19 = vunpack.c.h.bf16 %v2296_v45 }
 0x622   : > { %v2450_v45 = vadd.s32 4294967272, %v3804_v61 }
 0x623   : > { %v2370_v16 = vsel %vm2339_vm4, %v2333_v13, 0.0  ;;  %v2331_v18 = vmul.f32 %v3757_v17, %v2309_v14  ;;  %v2373_v20 = vsel %vm2339_vm4, %v2334_v15, 0.0  ;;  %v2332_v26 = vmul.f32 %v3757_v17, %v2310_v19 }
 0x624   : > { %v2909_v21 = vpop.f32.mrf.mxu1  ;;  %2371 = vadd.xlane.f32.xlu0 %v2370_v16  ;;  %v2457_v13 = vadd.s32 4294967264, %v3804_v61  ;;  %v2453_v16 = vsub.s32 %v2450_v45, %v3492_v44  ;;  %v2464_v19 = vadd.s32 4294967256, %v3804_v61 }
 0x625   : > { %v2270_v24 = vadd.f32 %v2909_v21, %v3748_v6  ;;  %v2364_v25 = vsel %vm2339_vm4, %v2331_v18, 0.0  ;;  %v2367_v34 = vsel %vm2339_vm4, %v2332_v26, 0.0 }
 0x626   : > { %v2261_v23 = vpop.f32.mrf.mxu1 }
 0x627   : > { %2391 = vperm.xlu1 %2955, %v2388_v22   ;;  %v2262_v28 = vadd.f32 %v3748_v6, %v2261_v23  ;;  %v2290_v31 = vmax.f32 %v2270_v24, 0.0  ;;  %v2460_v22 = vsub.s32 %v2457_v13, %v3492_v44  ;;  %v2471_v24 = vadd.s32 4294967248, %v3804_v61 }
 0x628   : > { %v2910_v27 = vpop.f32.mrf.mxu1  ;;  %2365 = vadd.xlane.f32.xlu0 %v2364_v25 }
 0x629   : > { %v2273_v29 = vadd.f32 %v2910_v27, %v3748_v6  ;;  %v2288_v35 = vmax.f32 %v2262_v28, 0.0  ;;  %v2467_v27 = vsub.s32 %v2464_v19, %v3492_v44 }
 0x62a   : > { %v2264_v30 = vpop.f32.mrf.mxu1 }
 0x62b   : > { %v2291_v32 = vmax.f32 %v2273_v29, 0.0  ;;  %v2265_v33 = vadd.f32 %v3748_v6, %v2264_v30  ;;  %v2478_v29 = vadd.s32 4294967240, %v3804_v61  ;;  %v2485_v30 = vadd.s32 4294967232, %v3804_v61 }
 0x62c   : > { %2368 = vadd.xlane.f32.xlu0 %v2367_v34 }
 0x62d   : > { %v2299_v36 = vpack.c.bf16 %v2291_v32, %v2290_v31  ;;  %v2289_v37 = vmax.f32 %v2265_v33, 0.0  ;;  %v2492_v32 = vadd.s32 4294967224, %v3804_v61 }
 0x62f   : > { %v2298_v38 = vpack.c.bf16 %v2289_v37, %v2288_v35  ;;  %v2315_v39 = vunpack.c.l.bf16 %v2299_v36  ;;  %v2316_v53 = vunpack.c.h.bf16 %v2299_v36  ;;  %v2474_v35 = vsub.s32 %v2471_v24, %v3492_v44 }
 0x630   : > { %v2481_v37 = vsub.s32 %v2478_v29, %v3492_v44 }
 0x631   : > { %v2337_v40 = vmul.f32 %v3757_v17, %v2315_v39  ;;  %v2313_v41 = vunpack.c.l.bf16 %v2298_v38  ;;  %v2314_v51 = vunpack.c.h.bf16 %v2298_v38  ;;  %v2338_v55 = vmul.f32 %v3757_v17, %v2316_v53 }
 0x632   : > { %v2488_v38 = vsub.s32 %v2485_v30, %v3492_v44  ;;  %v2506_v53 = vadd.s32 4294967208, %v3804_v61 }
 0x633   : > { %v2382_v47 = vsel %vm2339_vm4, %v2337_v40, 0.0  ;;  %v2335_v48 = vmul.f32 %v3757_v17, %v2313_v41  ;;  %v2336_v6 = vmul.f32 %v3757_v17, %v2314_v51  ;;  %v2385_v56 = vsel %vm2339_vm4, %v2338_v55, 0.0 }
 0x634   : > { %2383 = vadd.xlane.f32.xlu0 %v2382_v47  ;;  %v2495_v47 = vsub.s32 %v2492_v32, %v3492_v44 }
 0x635   : > { %v2376_v52 = vsel %vm2339_vm4, %v2335_v48, 0.0  ;;  %v2379_v54 = vsel %vm2339_vm4, %v2336_v6, 0.0 }
 0x638   : > { %2377 = vadd.xlane.f32.xlu0 %v2376_v52  ;;  %v2499_v52 = vadd.s32 4294967216, %v3804_v61 }
 0x63c   : > { %2380 = vadd.xlane.f32.xlu0 %v2379_v54 }
 0x640   : > { %2386 = vadd.xlane.f32.xlu0 %v2385_v56  ;;  %v2513_v56 = vadd.s32 4294967200, %v3804_v61 }
 0x642   : > { %v2516_v3 = vsub.s32 %v2513_v56, %v3492_v44 }
 0x64b   : > { %2374 = vadd.xlane.f32.xlu1 %v2373_v20 }
 0x68d   : > { %v2348_v63 = vpop.xlane.xlu1 %2347 }
 0x68f   : > { %v2342_v50 = vpop.xlane.xlu0 %2341 }
 0x691   : > { %v2351_v57 = vpop.xlane.xlu1 %2350 }
 0x693   : > { %v2345_v49 = vpop.xlane.xlu0 %2344 }
 0x69d   : > { %v2360_v62 = vpop.xlane.xlu0 %2359 }
 0x69f   : > { %v2357_v59 = vpop.xlane.xlu1 %2356 }
 0x6a1   : > { %v2354_v58 = vpop.xlane.xlu0 %2353 }
 0x6a3   : > { %v2392_v0 = vpop.permute.xlu1 %2391 }
 0x6a4   : > { %v3809_v17 = vrot.slane %v2392_v0, %v3496_v46  ;;  %v2509_v0 = vsub.s32 %v2506_v53, %v3492_v44 }
 0x6a5   : > { %v2363_v60 = vpop.xlane.xlu0 %2362 }
 0x6a6   : > { %v2398_v5 = vadd.f32 %v3809_v17, %v2342_v50  ;;  %v2399_v7 = vadd.f32 %v3809_v17, %v2345_v49  ;;  %v2400_v9 = vadd.f32 %v3809_v17, %v2348_v63  ;;  %v2401_v14 = vadd.f32 %v3809_v17, %v2351_v57 }
 0x6a7   : > { %v2402_v20 = vadd.f32 %v3809_v17, %v2354_v58  ;;  %v2403_v25 = vadd.f32 %v3809_v17, %v2357_v59  ;;  %v2404_v33 = vadd.f32 %v3809_v17, %v2360_v62  ;;  %v2405_v41 = vadd.f32 %v3809_v17, %v2363_v60 }
 0x6a8   : > { %v2435_v46 = vrot.slane %v2398_v5, %v2434_v8  ;;  %v2440_v42 = vrot.slane %v2399_v7, %v2439_v43  ;;  %v2447_v12 = vrot.slane %v2400_v9, %v2446_v10  ;;  %v2454_v23 = vrot.slane %v2401_v14, %v2453_v16 }
 0x6a9   : > { %v2461_v28 = vrot.slane %v2402_v20, %v2460_v22  ;;  %v2468_v36 = vrot.slane %v2403_v25, %v2467_v27  ;;  %v2475_v51 = vrot.slane %v2404_v33, %v2474_v35  ;;  %v2482_v50 = vrot.slane %v2405_v41, %v2481_v37 }
 0x6aa   : > { %v2442_v15 = vsel %vm2441_vm5, %v2440_v42, %v2435_v46  ;;  %v2520_v63 = vadd.s32 4294967192, %v3804_v61  ;;  %v2502_v62 = vsub.s32 %v2499_v52, %v3492_v44  ;;  %v2527_v58 = vadd.s32 4294967184, %v3804_v61 }
 0x6ab   : > { %v2449_v21 = vsel %vm2448_vm6, %v2447_v12, %v2442_v15  ;;  %v2534_v60 = vadd.s32 4294967176, %v3804_v61 }
 0x6ac   : > { %v2456_v26 = vsel %vm2455_vm7, %v2454_v23, %v2449_v21  ;;  %v2530_v10 = vsub.s32 %v2527_v58, %v3492_v44 }
 0x6ad   : > { %v3806_v1 = vpop.xlane.xlu0 %2371  ;;  %v2463_v34 = vsel %vm2462_vm8, %v2461_v28, %v2456_v26  ;;  %v2537_v42 = vsub.s32 %v2534_v60, %v3492_v44 }
 0x6ae   : > { %v2470_v40 = vsel %vm2469_vm9, %v2468_v36, %v2463_v34  ;;  %v2408_v57 = vadd.f32 %v3809_v17, %v3806_v1  ;;  %v2523_v1 = vsub.s32 %v2520_v63, %v3492_v44 }
 0x6af   : > { %v2477_v54 = vsel %vm2476_vm10, %v2475_v51, %v2470_v40 }
 0x6b0   : > { %v2484_v59 = vsel %vm2483_vm11, %v2482_v50, %v2477_v54  ;;  %v2503_v61 = vrot.slane %v2408_v57, %v2502_v62 }
 0x6b1   : > { %v2366_v4 = vpop.xlane.xlu0 %2365 }
 0x6b2   : > { %v2406_v39 = vadd.f32 %v3809_v17, %v2366_v4 }
 0x6b4   : > { %v2489_v55 = vrot.slane %v2406_v39, %v2488_v38 }
 0x6b5   : > { %v2369_v11 = vpop.xlane.xlu0 %2368 }
 0x6b6   : > { %v2407_v48 = vadd.f32 %v3809_v17, %v2369_v11  ;;  %v2491_v2 = vsel %vm2490_vm12, %v2489_v55, %v2484_v59 }
 0x6b8   : > { %v2496_v49 = vrot.slane %v2407_v48, %v2495_v47 }
 0x6ba   : > { %v2498_v8 = vsel %vm2497_vm13, %v2496_v49, %v2491_v2 }
 0x6bb   : > { %v2505_v13 = vsel %vm2504_vm14, %v2503_v61, %v2498_v8 }
 0x6bd   : > { %v2384_v18 = vpop.xlane.xlu0 %2383 }
 0x6be   : > { %v2412_v46 = vadd.f32 %v3809_v17, %v2384_v18 }
 0x6c0   : > { %v2531_v16 = vrot.slane %v2412_v46, %v2530_v10 }
 0x6c1   : > { %v2378_v31 = vpop.xlane.xlu0 %2377 }
 0x6c2   : > { %v2410_v4 = vadd.f32 %v3809_v17, %v2378_v31 }
 0x6c4   : > { %v2517_v12 = vrot.slane %v2410_v4, %v2516_v3 }
 0x6c5   : > { %v2381_v6 = vpop.xlane.xlu0 %2380 }
 0x6c6   : > { %v2411_v43 = vadd.f32 %v3809_v17, %v2381_v6 }
 0x6c8   : > { %v2524_v14 = vrot.slane %v2411_v43, %v2523_v1 }
 0x6c9   : > { %v2387_v5 = vpop.xlane.xlu0 %2386 }
 0x6ca   : > { %v2413_v45 = vadd.f32 %v3809_v17, %v2387_v5 }
 0x6cc   : > { %v2538_v44 = vrot.slane %v2413_v45, %v2537_v42 }
 0x6d4   : > { %v2375_v7 = vpop.xlane.xlu1 %2374 }
 0x6d5   : > { %v2409_v9 = vadd.f32 %v3809_v17, %v2375_v7 }
 0x6d7   : > { %v2510_v11 = vrot.slane %v2409_v9, %v2509_v0 }
 0x6d9   : > { %v2512_v15 = vsel %vm2511_vm15, %v2510_v11, %v2505_v13 }
 0x6da   : > { %v2519_v18 = vsel %vm2518_vm0, %v2517_v12, %v2512_v15 }
 0x6db   : > { %v2526_v19 = vsel %vm2525_vm1, %v2524_v14, %v2519_v18 }
 0x6dc   : > { %v2533_v17 = vsel %vm2532_vm2, %v2531_v16, %v2526_v19 }
 0x6dd   : > { %v2540_v20 = vsel %vm2539_vm3, %v2538_v44, %v2533_v17 }
 0x6de   : > { %2542 = vst [vmem:[%s545_s19] sm:$0x1] %v2540_v20 }
 0x6df   : > { %3082 = shalt.err (!%p3079_p3)
}
 0x6e0   : > { %s3083_s22 = scalar_lea.hbm %s3867_s25, 16  ;;  %s3087_s19 = scalar_lea.hbm %s3921_s17, 32 }
 0x6e1   : > { %p3084_p4 = scmp.ne.s32.totalorder %s3867_s25, %s3083_s22  ;;  %p3088_p9 = scmp.lt.s32.totalorder %s3867_s25, %s3921_s17 }
 0x6e2   : > { %p3089_p10 = scmp.lt.s32.totalorder %s3087_s19, %s3083_s22 }
 0x6e3   : > { %p3085_p7 = pnand %p3084_p4, %p3261_p5 }
 0x6e4   : > { %p3090_p11 = por %p3089_p10, %p3088_p9 }
 0x6e5   : > { %p3086_p8 = pneg %p3085_p7 }
 0x6e7   : > { %p3091_p12 = pnand %p3090_p11, %p3086_p8 }
 0x6e9   : > { %3094 = shalt.err (!%p3091_p12)
}
 0x6ea   : > { %2915 = dma.vmem_to_hbm [thread:$0]  (%p3261_p5), %s2557_s16, 16, %s3867_s25, %s2544_s0  }
 0x6eb PF: > { %s3941_s18 = sld [smem:[#allocation8_spill]] }
 0x6ec   : > { %s3942_s29 = sld [smem:[#allocation6_spill]] }
 0x6f1   : > { %p2921_p13 = scmp.ge.s32.totalorder %s3941_s18, 2 }
 0x6f2   : > { %s2568_s1 = sand.u32 1, %s3942_s29  }
 0x6f3   : > { %p2918_p0 = pnand %p2921_p13, %p3265_p6  ;;  %s2569_s30 = scalar_lea.sflag [#allocation4], %s2568_s1 }
 0x6f5   : > { %p2919_p1 = pneg %p2918_p0 }
 0x6f7   : > { %3112 = dma.done.wait (%p2919_p1), %s2569_s30, 16  }
 0x6f8   : > { %3114 = vsyncadd (%p2919_p1), %s2569_s30, 4294967280  ;;  %s3944_s29 = sld [smem:[#allocation9_spill]]  ;;  %s3947_s26 = smov %s3121_s27 }
 0x6f9   : > { %s3945_s22 = sld [smem:[#allocation7_spill]] }
 0x6fa   : > { %s3946_s28 = sld [smem:[#allocation10_spill]] }
 0x6fe   : > { %p29_p2 = scmp.ge.s32.totalorder %s3944_s29, 4  }
 0x6ff   : > { %s3948_s27 = smov %s3945_s22 }
 0x700   :  { %31 = sbr.rel (!%p29_p2) target bundleno = 6 (0x6), region = 123 }
 0x705   :  { %2573 = vsyncpa [#allocation4], 1 }
 0x706   :  { %2575 = vsyncpa [#allocation4 + $0x1], 1 }

</bundles_post_ra>
